<compile_context>
chip_gen: v6e
topology: v6e:2x2x1
jax: 0.10.0
libtpu: 0.0.40
codegen_flags: <defaults>
</compile_context>

<pallas_src>
import functools

import jax
import jax.numpy as jnp
from jax.experimental import pallas as pl
from jax.experimental.pallas import tpu as pltpu

_H1, _H2 = 400, 300     # true hidden sizes from the PyTorch module
_H1_PAD = 512           # 400 -> 512 (lane / 256-tile aligned on all gens)


def _round_up(n, m):
    return ((n + m - 1) // m) * m


def _cdiv(a, b):
    return -(-a // b)


def _device_kind():
    try:
        return jax.devices()[0].device_kind.lower()
    except Exception:
        return ""


def _h2_pad():
    # v6e/v7x MXU tiles are 256 wide: padding 300 -> 512 makes layer-2 N and
    # layer-3 K fully 256-aligned at no extra MXU passes.  On v5e (128-wide
    # MXU) 384 is already 3 full passes, so 512 would add a real extra pass.
    kind = _device_kind()
    if ("v6" in kind) or ("v7" in kind):
        return 512
    return 384


def _dimension_semantics():
    # Only CORE_PARALLEL actually changes codegen to split the grid across
    # v7x's two TensorCores; plain "parallel" vs "arbitrary" is ~neutral.
    kind = _device_kind()
    if "v7" in kind:
        return (pltpu.CORE_PARALLEL,)
    return ("parallel",)


def _actor_kernel(x_ref, w1_ref, b1_ref, w2_ref, b2_ref, w3_ref, b3_ref,
                  o_ref, *, max_action):
    # Layer 1: Linear + ReLU  (bf16 matmul inputs, f32 accumulate & epilogue)
    h1 = jnp.dot(x_ref[...].astype(jnp.bfloat16), w1_ref[...],
                 preferred_element_type=jnp.float32)
    h1 = jnp.maximum(h1 + b1_ref[...], 0.0)

    # Layer 2: Linear + ReLU
    h2 = jnp.dot(h1.astype(jnp.bfloat16), w2_ref[...],
                 preferred_element_type=jnp.float32)
    h2 = jnp.maximum(h2 + b2_ref[...], 0.0)

    # Layer 3: Linear, then max_action * tanh (tanh goes to the EUP slot)
    h3 = jnp.dot(h2.astype(jnp.bfloat16), w3_ref[...],
                 preferred_element_type=jnp.float32)
    o_ref[...] = (max_action * jnp.tanh(h3 + b3_ref[...])).astype(o_ref.dtype)


def _build_actor_call(b_pad, state_dim, a_pad, params, max_action, tb,
                      single_buffer_weights):
    w1, b1, w2, b2, w3, b3 = params
    kernel = functools.partial(_actor_kernel, max_action=float(max_action))

    def resident(arr):
        # Constant index_map: fetched once, resident across all batch tiles.
        kwargs = {}
        if single_buffer_weights:
            # No point double-buffering a block that never changes.
            kwargs["pipeline_mode"] = pl.Buffered(1)
        return pl.BlockSpec(arr.shape, lambda i: (0, 0), **kwargs)

    return pl.pallas_call(
        kernel,
        out_shape=jax.ShapeDtypeStruct((b_pad, a_pad), jnp.float32),
        grid=(b_pad // tb,),
        in_specs=[
            pl.BlockSpec((tb, state_dim), lambda i: (i, 0)),  # x: batch-tiled
            resident(w1), resident(b1),
            resident(w2), resident(b2),
            resident(w3), resident(b3),
        ],
        out_specs=pl.BlockSpec((tb, a_pad), lambda i: (i, 0)),
        compiler_params=pltpu.CompilerParams(
            dimension_semantics=_dimension_semantics(),
            vmem_limit_bytes=32 * 1024 * 1024,
        ),
    )


def actor_forward(x, params, max_action, action_dim, *, tb=1024):
    """Fused 3-layer MLP actor forward.  x: [B, state_dim] float32."""
    w3 = params[4]
    B, state_dim = x.shape
    a_pad = w3.shape[1]

    # Balanced batch tiles: split B into ceil(B/tb) near-equal tiles (rounded
    # up to 8 sublanes) instead of padding B up to a multiple of tb.
    n_tiles = max(_cdiv(B, tb), 1)
    TB = _round_up(_cdiv(B, n_tiles), 8)
    B_pad = _round_up(B, TB)
    if B_pad != B:
        x = jnp.pad(x, ((0, B_pad - B), (0, 0)))

    try:
        call = _build_actor_call(B_pad, state_dim, a_pad, params, max_action,
                                 TB, single_buffer_weights=True)
        out = call(x, *params)
    except Exception:
        # Fallback if pl.Buffered(1) single-buffering is rejected by this
        # jax/Mosaic version; costs ~0.5-1 MB extra VMEM, otherwise identical.
        call = _build_actor_call(B_pad, state_dim, a_pad, params, max_action,
                                 TB, single_buffer_weights=False)
        out = call(x, *params)

    return out[:B, :action_dim]


def init_actor_params(key, state_dim, action_dim, *, h2_pad=None):
    """nn.Linear-style U(-1/sqrt(fan_in), 1/sqrt(fan_in)) init.

    Weights are returned transposed to [in, out], zero-padded to lane-aligned
    shapes, and cast to bfloat16 (single-pass MXU); biases stay float32."""
    if h2_pad is None:
        h2_pad = _h2_pad()
    a_pad = _round_up(max(action_dim, 1), 128)
    dims = [
        # (fan_in, fan_out, padded_in, padded_out)
        (state_dim, _H1, state_dim, _H1_PAD),
        (_H1, _H2, _H1_PAD, h2_pad),
        (_H2, action_dim, h2_pad, a_pad),
    ]
    params = []
    for fan_in, fan_out, in_pad, out_pad in dims:
        key, kw, kb = jax.random.split(key, 3)
        bound = 1.0 / jnp.sqrt(float(fan_in))
        w = jax.random.uniform(kw, (fan_in, fan_out), jnp.float32, -bound, bound)
        b = jax.random.uniform(kb, (1, fan_out), jnp.float32, -bound, bound)
        # Zero padding: padded weight rows/cols and bias lanes are exactly
        # zero, so ReLU/tanh on padded lanes never leaks into real outputs.
        w_p = jnp.zeros((in_pad, out_pad), jnp.float32).at[:fan_in, :fan_out].set(w)
        b_p = jnp.zeros((1, out_pad), jnp.float32).at[:, :fan_out].set(b)
        params += [w_p.astype(jnp.bfloat16), b_p]
    return tuple(params)


def actor_forward_ref(x, params, max_action, action_dim):
    """Pure-JAX reference with identical bf16-matmul / f32-accumulate numerics."""
    w1, b1, w2, b2, w3, b3 = params
    h1 = jnp.maximum(
        jnp.dot(x.astype(jnp.bfloat16), w1, preferred_element_type=jnp.float32) + b1, 0.0)
    h2 = jnp.maximum(
        jnp.dot(h1.astype(jnp.bfloat16), w2, preferred_element_type=jnp.float32) + b2, 0.0)
    y = max_action * jnp.tanh(
        jnp.dot(h2.astype(jnp.bfloat16), w3, preferred_element_type=jnp.float32) + b3)
    return y[:, :action_dim]


if __name__ == "__main__":
    state_dim, action_dim = 32, 4
    max_action = 2.0

    key = jax.random.PRNGKey(0)
    key, kx1, kx2 = jax.random.split(key, 3)
    params = init_actor_params(key, state_dim, action_dim)

    # 1) Small single-tile batch (latency-bound path).
    x1 = jax.random.normal(kx1, (8, state_dim), jnp.float32)
    out1 = jax.block_until_ready(actor_forward(x1, params, max_action, action_dim))
    ref1 = actor_forward_ref(x1, params, max_action, action_dim)
    assert out1.shape == (8, action_dim)
    assert jnp.allclose(out1, ref1, atol=2e-3, rtol=2e-3), "mismatch (B=8)"

    # 2) Non-multiple batch with a small tb override: exercises the balanced
    #    tail-tile computation (B=40, tb=16 -> 3 tiles of 16, B_pad=48).
    x2 = jax.random.normal(kx2, (40, state_dim), jnp.float32)
    out2 = jax.block_until_ready(
        actor_forward(x2, params, max_action, action_dim, tb=16))
    ref2 = actor_forward_ref(x2, params, max_action, action_dim)
    assert out2.shape == (40, action_dim)
    assert jnp.allclose(out2, ref2, atol=2e-3, rtol=2e-3), "mismatch (B=40)"

    print("KERNEL_OK")
</pallas_src>

<mosaic_0001>
module attributes {stable_mosaic.version = 11 : i64} {
  func.func @_actor_kernel(%arg0: i32, %arg1: memref<8x32xf32, #tpu.memory_space<vmem>>, %arg2: memref<32x512xbf16, #tpu.memory_space<vmem>>, %arg3: memref<1x512xf32, #tpu.memory_space<vmem>>, %arg4: memref<512x384xbf16, #tpu.memory_space<vmem>>, %arg5: memref<1x384xf32, #tpu.memory_space<vmem>>, %arg6: memref<384x128xbf16, #tpu.memory_space<vmem>>, %arg7: memref<1x128xf32, #tpu.memory_space<vmem>>, %arg8: memref<8x128xf32, #tpu.memory_space<vmem>>) attributes {dimension_semantics = [#tpu.dimension_semantics<parallel>], iteration_bounds = array<i64: 1>, scalar_prefetch = 0 : i64, scratch_operands = 0 : i64, tpu.core_type = #tpu.core_type<tc>, window_params = [{transform_indices = @transform_0, window_bounds = array<i64: 8, 32>}, {pipeline_mode = #tpu.pipeline_mode<synchronous>, transform_indices = @transform_1, window_bounds = array<i64: 32, 512>}, {pipeline_mode = #tpu.pipeline_mode<synchronous>, transform_indices = @transform_2, window_bounds = array<i64: 1, 512>}, {pipeline_mode = #tpu.pipeline_mode<synchronous>, transform_indices = @transform_3, window_bounds = array<i64: 512, 384>}, {pipeline_mode = #tpu.pipeline_mode<synchronous>, transform_indices = @transform_4, window_bounds = array<i64: 1, 384>}, {pipeline_mode = #tpu.pipeline_mode<synchronous>, transform_indices = @transform_5, window_bounds = array<i64: 384, 128>}, {pipeline_mode = #tpu.pipeline_mode<synchronous>, transform_indices = @transform_6, window_bounds = array<i64: 1, 128>}, {transform_indices = @transform_7, window_bounds = array<i64: 8, 128>}]} {
    %c0 = arith.constant 0 : index
    %c0_0 = arith.constant 0 : index
    %0 = vector.load %arg1[%c0, %c0_0] : memref<8x32xf32, #tpu.memory_space<vmem>>, vector<8x32xf32>
    %1 = arith.truncf %0 : vector<8x32xf32> to vector<8x32xbf16>
    %c0_1 = arith.constant 0 : index
    %c0_2 = arith.constant 0 : index
    %2 = vector.load %arg2[%c0_1, %c0_2] : memref<32x512xbf16, #tpu.memory_space<vmem>>, vector<32x512xbf16>
    %cst = arith.constant dense<0.000000e+00> : vector<8x512xf32>
    %3 = tpu.matmul %1, %2, %cst {dimension_numbers = #tpu.dot_dimension_numbers<[1], [0], [0], [1], [0, 0, 1, 1], [], []>} : vector<8x32xbf16>, vector<32x512xbf16>, vector<8x512xf32> -> vector<8x512xf32>
    %c0_3 = arith.constant 0 : index
    %c0_4 = arith.constant 0 : index
    %4 = vector.load %arg3[%c0_3, %c0_4] : memref<1x512xf32, #tpu.memory_space<vmem>>, vector<1x512xf32>
    %5 = vector.broadcast %4 : vector<1x512xf32> to vector<8x512xf32>
    %6 = arith.addf %3, %5 : vector<8x512xf32>
    %cst_5 = arith.constant 0.000000e+00 : f32
    %7 = vector.broadcast %cst_5 : f32 to vector<8x512xf32>
    %8 = arith.maximumf %6, %7 : vector<8x512xf32>
    %9 = arith.truncf %8 : vector<8x512xf32> to vector<8x512xbf16>
    %c0_6 = arith.constant 0 : index
    %c0_7 = arith.constant 0 : index
    %10 = vector.load %arg4[%c0_6, %c0_7] : memref<512x384xbf16, #tpu.memory_space<vmem>>, vector<512x384xbf16>
    %cst_8 = arith.constant dense<0.000000e+00> : vector<8x384xf32>
    %11 = tpu.matmul %9, %10, %cst_8 {dimension_numbers = #tpu.dot_dimension_numbers<[1], [0], [0], [1], [0, 0, 1, 1], [], []>} : vector<8x512xbf16>, vector<512x384xbf16>, vector<8x384xf32> -> vector<8x384xf32>
    %c0_9 = arith.constant 0 : index
    %c0_10 = arith.constant 0 : index
    %12 = vector.load %arg5[%c0_9, %c0_10] : memref<1x384xf32, #tpu.memory_space<vmem>>, vector<1x384xf32>
    %13 = vector.broadcast %12 : vector<1x384xf32> to vector<8x384xf32>
    %14 = arith.addf %11, %13 : vector<8x384xf32>
    %cst_11 = arith.constant 0.000000e+00 : f32
    %15 = vector.broadcast %cst_11 : f32 to vector<8x384xf32>
    %16 = arith.maximumf %14, %15 : vector<8x384xf32>
    %17 = arith.truncf %16 : vector<8x384xf32> to vector<8x384xbf16>
    %c0_12 = arith.constant 0 : index
    %c0_13 = arith.constant 0 : index
    %18 = vector.load %arg6[%c0_12, %c0_13] : memref<384x128xbf16, #tpu.memory_space<vmem>>, vector<384x128xbf16>
    %cst_14 = arith.constant dense<0.000000e+00> : vector<8x128xf32>
    %19 = tpu.matmul %17, %18, %cst_14 {dimension_numbers = #tpu.dot_dimension_numbers<[1], [0], [0], [1], [0, 0, 1, 1], [], []>} : vector<8x384xbf16>, vector<384x128xbf16>, vector<8x128xf32> -> vector<8x128xf32>
    %c0_15 = arith.constant 0 : index
    %c0_16 = arith.constant 0 : index
    %20 = vector.load %arg7[%c0_15, %c0_16] : memref<1x128xf32, #tpu.memory_space<vmem>>, vector<1x128xf32>
    %21 = vector.broadcast %20 : vector<1x128xf32> to vector<8x128xf32>
    %22 = arith.addf %19, %21 : vector<8x128xf32>
    %23 = math.tanh %22 : vector<8x128xf32>
    %cst_17 = arith.constant 2.000000e+00 : f32
    %24 = vector.broadcast %cst_17 : f32 to vector<8x128xf32>
    %25 = arith.mulf %24, %23 : vector<8x128xf32>
    %c0_18 = arith.constant 0 : index
    %c0_19 = arith.constant 0 : index
    %26 = vector.load %arg8[%c0_18, %c0_19] : memref<8x128xf32, #tpu.memory_space<vmem>>, vector<8x128xf32>
    tpu.vector_store %arg8[%c0_18, %c0_19], %25 {strides = array<i32>} : memref<8x128xf32, #tpu.memory_space<vmem>>, vector<8x128xf32>,
    return
  }
  func.func @transform_0(%arg0: i32) -> (i32, i32) {
    %c0_i32 = arith.constant 0 : i32
    %c0_i32_0 = arith.constant 0 : i32
    return %arg0, %c0_i32 : i32, i32
  }
  func.func @transform_1(%arg0: i32) -> (i32, i32) {
    %c0_i32 = arith.constant 0 : i32
    %c0_i32_0 = arith.constant 0 : i32
    %c0_i32_1 = arith.constant 0 : i32
    return %c0_i32, %c0_i32_0 : i32, i32
  }
  func.func @transform_2(%arg0: i32) -> (i32, i32) {
    %c0_i32 = arith.constant 0 : i32
    %c0_i32_0 = arith.constant 0 : i32
    %c0_i32_1 = arith.constant 0 : i32
    return %c0_i32, %c0_i32_0 : i32, i32
  }
  func.func @transform_3(%arg0: i32) -> (i32, i32) {
    %c0_i32 = arith.constant 0 : i32
    %c0_i32_0 = arith.constant 0 : i32
    %c0_i32_1 = arith.constant 0 : i32
    return %c0_i32, %c0_i32_0 : i32, i32
  }
  func.func @transform_4(%arg0: i32) -> (i32, i32) {
    %c0_i32 = arith.constant 0 : i32
    %c0_i32_0 = arith.constant 0 : i32
    %c0_i32_1 = arith.constant 0 : i32
    return %c0_i32, %c0_i32_0 : i32, i32
  }
  func.func @transform_5(%arg0: i32) -> (i32, i32) {
    %c0_i32 = arith.constant 0 : i32
    %c0_i32_0 = arith.constant 0 : i32
    %c0_i32_1 = arith.constant 0 : i32
    return %c0_i32, %c0_i32_0 : i32, i32
  }
  func.func @transform_6(%arg0: i32) -> (i32, i32) {
    %c0_i32 = arith.constant 0 : i32
    %c0_i32_0 = arith.constant 0 : i32
    %c0_i32_1 = arith.constant 0 : i32
    return %c0_i32, %c0_i32_0 : i32, i32
  }
  func.func @transform_7(%arg0: i32) -> (i32, i32) {
    %c0_i32 = arith.constant 0 : i32
    %c0_i32_0 = arith.constant 0 : i32
    return %arg0, %c0_i32 : i32, i32
  }
}

module attributes {stable_mosaic.version = 11 : i64} {
  func.func @_actor_kernel(%arg0: i32, %arg1: memref<8x32xf32, #tpu.memory_space<vmem>>, %arg2: memref<32x512xbf16, #tpu.memory_space<vmem>>, %arg3: memref<1x512xf32, #tpu.memory_space<vmem>>, %arg4: memref<512x384xbf16, #tpu.memory_space<vmem>>, %arg5: memref<1x384xf32, #tpu.memory_space<vmem>>, %arg6: memref<384x128xbf16, #tpu.memory_space<vmem>>, %arg7: memref<1x128xf32, #tpu.memory_space<vmem>>, %arg8: memref<8x128xf32, #tpu.memory_space<vmem>>) attributes {dimension_semantics = [#tpu.dimension_semantics<parallel>], iteration_bounds = array<i64: 1>, scalar_prefetch = 0 : i64, scratch_operands = 0 : i64, tpu.core_type = #tpu.core_type<tc>, window_params = [{transform_indices = @transform_0, window_bounds = array<i64: 8, 32>}, {pipeline_mode = #tpu.pipeline_mode<synchronous>, transform_indices = @transform_1, window_bounds = array<i64: 32, 512>}, {pipeline_mode = #tpu.pipeline_mode<synchronous>, transform_indices = @transform_2, window_bounds = array<i64: 1, 512>}, {pipeline_mode = #tpu.pipeline_mode<synchronous>, transform_indices = @transform_3, window_bounds = array<i64: 512, 384>}, {pipeline_mode = #tpu.pipeline_mode<synchronous>, transform_indices = @transform_4, window_bounds = array<i64: 1, 384>}, {pipeline_mode = #tpu.pipeline_mode<synchronous>, transform_indices = @transform_5, window_bounds = array<i64: 384, 128>}, {pipeline_mode = #tpu.pipeline_mode<synchronous>, transform_indices = @transform_6, window_bounds = array<i64: 1, 128>}, {transform_indices = @transform_7, window_bounds = array<i64: 8, 128>}]} {
    %c0 = arith.constant 0 : index
    %c0_0 = arith.constant 0 : index
    %0 = vector.load %arg1[%c0, %c0_0] : memref<8x32xf32, #tpu.memory_space<vmem>>, vector<8x32xf32>
    %1 = arith.truncf %0 : vector<8x32xf32> to vector<8x32xbf16>
    %c0_1 = arith.constant 0 : index
    %c0_2 = arith.constant 0 : index
    %2 = vector.load %arg2[%c0_1, %c0_2] : memref<32x512xbf16, #tpu.memory_space<vmem>>, vector<32x512xbf16>
    %cst = arith.constant dense<0.000000e+00> : vector<8x512xf32>
    %3 = tpu.matmul %1, %2, %cst {dimension_numbers = #tpu.dot_dimension_numbers<[1], [0], [0], [1], [0, 0, 1, 1], [], []>} : vector<8x32xbf16>, vector<32x512xbf16>, vector<8x512xf32> -> vector<8x512xf32>
    %c0_3 = arith.constant 0 : index
    %c0_4 = arith.constant 0 : index
    %4 = vector.load %arg3[%c0_3, %c0_4] : memref<1x512xf32, #tpu.memory_space<vmem>>, vector<1x512xf32>
    %5 = vector.broadcast %4 : vector<1x512xf32> to vector<8x512xf32>
    %6 = arith.addf %3, %5 : vector<8x512xf32>
    %cst_5 = arith.constant 0.000000e+00 : f32
    %7 = vector.broadcast %cst_5 : f32 to vector<8x512xf32>
    %8 = arith.maximumf %6, %7 : vector<8x512xf32>
    %9 = arith.truncf %8 : vector<8x512xf32> to vector<8x512xbf16>
    %c0_6 = arith.constant 0 : index
    %c0_7 = arith.constant 0 : index
    %10 = vector.load %arg4[%c0_6, %c0_7] : memref<512x384xbf16, #tpu.memory_space<vmem>>, vector<512x384xbf16>
    %cst_8 = arith.constant dense<0.000000e+00> : vector<8x384xf32>
    %11 = tpu.matmul %9, %10, %cst_8 {dimension_numbers = #tpu.dot_dimension_numbers<[1], [0], [0], [1], [0, 0, 1, 1], [], []>} : vector<8x512xbf16>, vector<512x384xbf16>, vector<8x384xf32> -> vector<8x384xf32>
    %c0_9 = arith.constant 0 : index
    %c0_10 = arith.constant 0 : index
    %12 = vector.load %arg5[%c0_9, %c0_10] : memref<1x384xf32, #tpu.memory_space<vmem>>, vector<1x384xf32>
    %13 = vector.broadcast %12 : vector<1x384xf32> to vector<8x384xf32>
    %14 = arith.addf %11, %13 : vector<8x384xf32>
    %cst_11 = arith.constant 0.000000e+00 : f32
    %15 = vector.broadcast %cst_11 : f32 to vector<8x384xf32>
    %16 = arith.maximumf %14, %15 : vector<8x384xf32>
    %17 = arith.truncf %16 : vector<8x384xf32> to vector<8x384xbf16>
    %c0_12 = arith.constant 0 : index
    %c0_13 = arith.constant 0 : index
    %18 = vector.load %arg6[%c0_12, %c0_13] : memref<384x128xbf16, #tpu.memory_space<vmem>>, vector<384x128xbf16>
    %cst_14 = arith.constant dense<0.000000e+00> : vector<8x128xf32>
    %19 = tpu.matmul %17, %18, %cst_14 {dimension_numbers = #tpu.dot_dimension_numbers<[1], [0], [0], [1], [0, 0, 1, 1], [], []>} : vector<8x384xbf16>, vector<384x128xbf16>, vector<8x128xf32> -> vector<8x128xf32>
    %c0_15 = arith.constant 0 : index
    %c0_16 = arith.constant 0 : index
    %20 = vector.load %arg7[%c0_15, %c0_16] : memref<1x128xf32, #tpu.memory_space<vmem>>, vector<1x128xf32>
    %21 = vector.broadcast %20 : vector<1x128xf32> to vector<8x128xf32>
    %22 = arith.addf %19, %21 : vector<8x128xf32>
    %23 = math.tanh %22 : vector<8x128xf32>
    %cst_17 = arith.constant 2.000000e+00 : f32
    %24 = vector.broadcast %cst_17 : f32 to vector<8x128xf32>
    %25 = arith.mulf %24, %23 : vector<8x128xf32>
    %c0_18 = arith.constant 0 : index
    %c0_19 = arith.constant 0 : index
    %26 = vector.load %arg8[%c0_18, %c0_19] : memref<8x128xf32, #tpu.memory_space<vmem>>, vector<8x128xf32>
    tpu.vector_store %arg8[%c0_18, %c0_19], %25 {strides = array<i32>} : memref<8x128xf32, #tpu.memory_space<vmem>>, vector<8x128xf32>,
    return
  }
  func.func @transform_0(%arg0: i32) -> (i32, i32) {
    %c0_i32 = arith.constant 0 : i32
    %c0_i32_0 = arith.constant 0 : i32
    return %arg0, %c0_i32 : i32, i32
  }
  func.func @transform_1(%arg0: i32) -> (i32, i32) {
    %c0_i32 = arith.constant 0 : i32
    %c0_i32_0 = arith.constant 0 : i32
    %c0_i32_1 = arith.constant 0 : i32
    return %c0_i32, %c0_i32_0 : i32, i32
  }
  func.func @transform_2(%arg0: i32) -> (i32, i32) {
    %c0_i32 = arith.constant 0 : i32
    %c0_i32_0 = arith.constant 0 : i32
    %c0_i32_1 = arith.constant 0 : i32
    return %c0_i32, %c0_i32_0 : i32, i32
  }
  func.func @transform_3(%arg0: i32) -> (i32, i32) {
    %c0_i32 = arith.constant 0 : i32
    %c0_i32_0 = arith.constant 0 : i32
    %c0_i32_1 = arith.constant 0 : i32
    return %c0_i32, %c0_i32_0 : i32, i32
  }
  func.func @transform_4(%arg0: i32) -> (i32, i32) {
    %c0_i32 = arith.constant 0 : i32
    %c0_i32_0 = arith.constant 0 : i32
    %c0_i32_1 = arith.constant 0 : i32
    return %c0_i32, %c0_i32_0 : i32, i32
  }
  func.func @transform_5(%arg0: i32) -> (i32, i32) {
    %c0_i32 = arith.constant 0 : i32
    %c0_i32_0 = arith.constant 0 : i32
    %c0_i32_1 = arith.constant 0 : i32
    return %c0_i32, %c0_i32_0 : i32, i32
  }
  func.func @transform_6(%arg0: i32) -> (i32, i32) {
    %c0_i32 = arith.constant 0 : i32
    %c0_i32_0 = arith.constant 0 : i32
    %c0_i32_1 = arith.constant 0 : i32
    return %c0_i32, %c0_i32_0 : i32, i32
  }
  func.func @transform_7(%arg0: i32) -> (i32, i32) {
    %c0_i32 = arith.constant 0 : i32
    %c0_i32_0 = arith.constant 0 : i32
    return %arg0, %c0_i32 : i32, i32
  }
}

</mosaic_0001>

<bundles_post_ra>
// kernel: tpu_custom_call.1
= control target key start
LH: loop header
LB: loop body
LE: loop exit
PB: predicated region body
PF: predicated region fallthrough
CT: control target
= control target key end

     0   :  { %12 = vsyncpa [#allocation3], 0  ;;  %s2022_s0 = inlined_call_operand.hbm [shape: f32[8,32], index: 0, kind: input, shape index: {}]   ;;  %s2023_s1 = inlined_call_operand.hbm [shape: bf16[32,512], index: 1, kind: input, shape index: {}]   ;;  %s2024_s2 = inlined_call_operand.hbm [shape: f32[1,512], index: 2, kind: input, shape index: {}]   ;;  %s2025_s3 = inlined_call_operand.hbm [shape: bf16[512,384], index: 3, kind: input, shape index: {}]   ;;  %s2026_s4 = inlined_call_operand.vmem [shape: f32[1,384], index: 4, kind: input, shape index: {}]   ;;  %s2027_s5 = inlined_call_operand.hbm [shape: bf16[384,128], index: 5, kind: input, shape index: {}]   ;;  %s2028_s6 = inlined_call_operand.vmem [shape: f32[1,128], index: 6, kind: input, shape index: {}]   ;;  %s2029_s7 = inlined_call_operand.hbm [shape: f32[8,128], index: 7, kind: output, shape index: {}]  }
   0x1   :  { %13 = vsyncpa [#allocation6], 0 }
   0x2   :  { %14 = vsyncpa [#allocation9], 0 }
   0x3   :  { %15 = vsyncpa [#allocation4], 0  ;;  %s1917_s24 = smov [#allocation5]  }
   0x4   :  { %s31_s25 = sshll.u32 %s1917_s24, 4  ;;  %s32_s25 = int_to_ptr.vmem [resolvable:$true] %s31_s25 }
   0x5   :  { %s1797_s26 = scalar_lea.vmem %s32_s25, 1024  ;;  %p1802_p1 = scmp.lt.s32.totalorder %s32_s25, %s32_s25 }
   0x6   :  { %p1798_p0 = scmp.ne.s32.totalorder %s32_s25, %s1797_s26  ;;  %p1803_p2 = scmp.lt.s32.totalorder %s1797_s26, %s1797_s26 }
   0x8   :  { %p1804_p3 = por %p1803_p2, %p1802_p1 }
   0xa   :  { %p1805_p4 = pnand %p1804_p3, %p1798_p0 }
   0xc   :  { %1808 = shalt.err (!%p1805_p4)
}
   0xd   :  { %s1918_s27 = smov 256   ;;  %s1919_s28 = smov 16  }
   0xe   :  { %37 = dma.hbm_to_vmem [thread:$0]  %s2023_s1, 1024, %s32_s25, [#allocation6], %s1918_s27, %s1918_s27, %s1919_s28  }
   0xf   :  { %s1920_s8 = smov [#allocation8]  }
  0x10   :  { %s53_s9 = sshll.u32 %s1920_s8, 4  ;;  %s54_s9 = int_to_ptr.vmem [resolvable:$true] %s53_s9 }
  0x11   :  { %s1817_s10 = scalar_lea.vmem %s54_s9, 12288  ;;  %p1822_p6 = scmp.lt.s32.totalorder %s54_s9, %s54_s9 }
  0x12   :  { %p1818_p5 = scmp.ne.s32.totalorder %s54_s9, %s1817_s10  ;;  %p1823_p7 = scmp.lt.s32.totalorder %s1817_s10, %s1817_s10 }
  0x14   :  { %p1824_p8 = por %p1823_p7, %p1822_p6 }
  0x16   :  { %p1825_p9 = pnand %p1824_p8, %p1818_p5 }
  0x18   :  { %1828 = shalt.err (!%p1825_p9)
}
  0x19   :  { %s1921_s11 = smov 192   ;;  %s1922_s12 = smov 12  }
  0x1a   :  { %59 = dma.hbm_to_vmem [thread:$0]  %s2025_s3, 12288, %s54_s9, [#allocation9], %s1921_s11, %s1921_s11, %s1922_s12  }
  0x1b   :  { %s1923_s15 = smov [#allocation2]   ;;  %s1924_s17 = smov [#allocation7]  }
  0x1c   :  { %s22_s16 = sshll.u32 %s1923_s15, 4  ;;  %s44_s1 = sshll.u32 %s1924_s17, 4  ;;  %s23_s16 = int_to_ptr.vmem [resolvable:$true] %s22_s16  ;;  %s45_s1 = int_to_ptr.vmem [resolvable:$true] %s44_s1 }
  0x1d   :  { %s1837_s18 = scalar_lea.vmem %s23_s16, 128  ;;  %p1842_p11 = scmp.lt.s32.totalorder %s23_s16, %s23_s16 }
  0x1e   :  { %p1838_p10 = scmp.ne.s32.totalorder %s23_s16, %s1837_s18  ;;  %p1843_p12 = scmp.lt.s32.totalorder %s1837_s18, %s1837_s18 }
  0x20   :  { %p1844_p13 = por %p1843_p12, %p1842_p11 }
  0x22   :  { %p1845_p0 = pnand %p1844_p13, %p1838_p10 }
  0x24   :  { %1848 = shalt.err (!%p1845_p0)
}
  0x25   :  { %25 = dma.hbm_to_vmem [thread:$0]  %s2022_s0, 128, %s23_s16, [#allocation3]  }
  0x26   :  { %s1857_s21 = scalar_lea.vmem %s45_s1, 64  ;;  %p1862_p2 = scmp.lt.s32.totalorder %s45_s1, %s45_s1 }
  0x27   :  { %p1858_p1 = scmp.ne.s32.totalorder %s45_s1, %s1857_s21  ;;  %p1863_p3 = scmp.lt.s32.totalorder %s1857_s21, %s1857_s21 }
  0x29   :  { %p1864_p4 = por %p1863_p3, %p1862_p2 }
  0x2b   :  { %p1865_p5 = pnand %p1864_p4, %p1858_p1 }
  0x2d   :  { %1868 = shalt.err (!%p1865_p5)
}
  0x2e   :  { %47 = dma.hbm_to_vmem [thread:$0]  %s2024_s2, 64, %s45_s1, [#allocation6]  }
  0x2f   :  { %s1925_s23 = smov [#allocation10]  }
  0x30   :  { %s67_s24 = sshll.u32 %s1925_s23, 4  ;;  %s68_s24 = int_to_ptr.vmem [resolvable:$true] %s67_s24 }
  0x31   :  { %s1877_s25 = scalar_lea.vmem %s68_s24, 3072  ;;  %p1882_p7 = scmp.lt.s32.totalorder %s68_s24, %s68_s24 }
  0x32   :  { %p1878_p6 = scmp.ne.s32.totalorder %s68_s24, %s1877_s25  ;;  %p1883_p8 = scmp.lt.s32.totalorder %s1877_s25, %s1877_s25 }
  0x34   :  { %p1884_p9 = por %p1883_p8, %p1882_p7 }
  0x36   :  { %p1885_p10 = pnand %p1884_p9, %p1878_p6 }
  0x38   :  { %1888 = shalt.err (!%p1885_p10)
}
  0x39   :  { %s1926_s0 = smov 64   ;;  %s1927_s26 = smov 4  }
  0x3a   :  { %73 = dma.hbm_to_vmem [thread:$0]  %s2027_s5, 3072, %s68_s24, [#allocation9], %s1926_s0, %s1926_s0, %s1927_s26  }
  0x3b   :  { %1909 = dma.done.wait [#allocation3], 128  }
  0x3c   :  { %1910 = vsyncadd [#allocation3], 4294967168 }
  0x3d   :  { %1911 = dma.done.wait [#allocation6], 1088  }
  0x3e   :  { %1912 = vsyncadd [#allocation6], 4294966208 }
  0x3f   :  { %1913 = dma.done.wait [#allocation9], 15360  }
  0x40   :  { %1914 = vsyncadd [#allocation9], 4294951936  ;;  %v1928_v0 = vmov 0   ;;  %v1623_v1 = vld [vmem:[#allocation5 + $0x24] ss:$16 sps:$4 sm:$0xff]   ;;  %v92_v9 = vld [vmem:[#allocation2] sm:$0xff] }
  0x41   :  { %200 = vmatprep.mubr.bf16.mxu0 %v1928_v0  ;;  %241 = vmatprep.mubr.bf16.mxu1 %v1928_v0  ;;  %v1625_v2 = vld [vmem:[#allocation5 + $0x2c] ss:$16 sps:$4 sm:$0xff]   ;;  %v1627_v3 = vld [vmem:[#allocation5 + $0x20] ss:$16 sps:$4 sm:$0xff]   ;;  %v1628_v4 = vld [vmem:[#allocation5 + $0x28] ss:$16 sps:$4 sm:$0xff]   ;;  %v93_v12 = vpack.c.bf16 %v92_v9, %v92_v9 }
  0x42   :  { %180 = vmatprep.subr.bf16.mxu0 %v1623_v1  ;;  %221 = vmatprep.subr.bf16.mxu1 %v1625_v2  ;;  %v1629_v5 = vld [vmem:[#allocation5 + $0x4] ss:$16 sps:$4 sm:$0xff]   ;;  %v1631_v6 = vld [vmem:[#allocation5 + $0xc] ss:$16 sps:$4 sm:$0xff]   ;;  %v1633_v7 = vld [vmem:[#allocation5] ss:$16 sps:$4 sm:$0xff]  }
  0x43   :  { %181 = vmatpush1.bf16.msra.mxu0 %v1627_v3  ;;  %222 = vmatpush1.bf16.msra.mxu1 %v1628_v4  ;;  %v1634_v8 = vld [vmem:[#allocation5 + $0x8] ss:$16 sps:$4 sm:$0xff]   ;;  %v1637_v11 = vld [vmem:[#allocation8 + $0xac] ss:$12 sps:$4 sm:$0xff]   ;;  %vm164_vm0 = vcmask 261120   ;;  %vm1930_vm1 = vmmov 0  }
  0x44   :  { %182 = vmatprep.subr.bf16.mxu0 %v1629_v5  ;;  %223 = vmatprep.subr.bf16.mxu1 %v1631_v6  ;;  %v1635_v10 = vld [vmem:[#allocation8 + $0xa8] ss:$12 sps:$4 sm:$0xff]   ;;  %v1640_v14 = vld [vmem:[#allocation8 + $0x22c] ss:$12 sps:$4 sm:$0xff]   ;;  %v1641_v17 = vld [vmem:[#allocation8 + $0x90] ss:$12 sps:$4 sm:$0xff]  }
  0x45   :  { %v1638_v13 = vld [vmem:[#allocation8 + $0x228] ss:$12 sps:$4 sm:$0xff]   ;;  %v1644_v18 = vld [vmem:[#allocation8 + $0x210] ss:$12 sps:$4 sm:$0xff]   ;;  %v1647_v21 = vld [vmem:[#allocation8 + $0x78] ss:$12 sps:$4 sm:$0xff]  }
  0x46   :  { %v1643_v15 = vld [vmem:[#allocation8 + $0x94] ss:$12 sps:$4 sm:$0xff]   ;;  %v1649_v19 = vld [vmem:[#allocation8 + $0x7c] ss:$12 sps:$4 sm:$0xff]   ;;  %v1650_v22 = vld [vmem:[#allocation8 + $0x1f8] ss:$12 sps:$4 sm:$0xff]  }
  0x47   :  { %183 = vmatpush1.bf16.msra.mxu0 %v1633_v7  ;;  %224 = vmatpush1.bf16.msra.mxu1 %v1634_v8  ;;  %v1646_v16 = vld [vmem:[#allocation8 + $0x214] ss:$12 sps:$4 sm:$0xff]   ;;  %v1652_v20 = vld [vmem:[#allocation8 + $0x1fc] ss:$12 sps:$4 sm:$0xff]   ;;  %v1655_v23 = vld [vmem:[#allocation8 + $0x64] ss:$12 sps:$4 sm:$0xff]  }
  0x48   :  { %915 = vmatprep.subr.bf16.mxu0 %v1637_v11  ;;  %956 = vmatprep.subr.bf16.mxu1 %v1640_v14  ;;  %v1658_v24 = vld [vmem:[#allocation8 + $0x1e4] ss:$12 sps:$4 sm:$0xff]   ;;  %v1653_v25 = vld [vmem:[#allocation8 + $0x60] ss:$12 sps:$4 sm:$0xff]   ;;  %v1659_v29 = vld [vmem:[#allocation8 + $0x48] ss:$12 sps:$4 sm:$0xff]  }
  0x49   :  { %v1656_v26 = vld [vmem:[#allocation8 + $0x1e0] ss:$12 sps:$4 sm:$0xff]   ;;  %v1662_v30 = vld [vmem:[#allocation8 + $0x1c8] ss:$12 sps:$4 sm:$0xff]   ;;  %v1665_v33 = vld [vmem:[#allocation8 + $0x30] ss:$12 sps:$4 sm:$0xff]  }
  0x4a   :  { %1390 = vmatmul.mubr.msk.bf16.vlgmr.msra.gmra.mxu0 %vm164_vm0, %v93_v12  ;;  %1391 = vmatmul.mubr.msk.bf16.vlgmr.msra.gmra.mxu1 %vm164_vm0, %v93_v12  ;;  %v1661_v27 = vld [vmem:[#allocation8 + $0x4c] ss:$12 sps:$4 sm:$0xff]   ;;  %v1667_v31 = vld [vmem:[#allocation8 + $0x34] ss:$12 sps:$4 sm:$0xff]   ;;  %v1668_v34 = vld [vmem:[#allocation8 + $0x1b0] ss:$12 sps:$4 sm:$0xff]  }
  0x4b   :  { %916 = vmatpush1.bf16.msra.mxu0 %v1635_v10  ;;  %957 = vmatpush1.bf16.msra.mxu1 %v1638_v13  ;;  %v1664_v28 = vld [vmem:[#allocation8 + $0x1cc] ss:$12 sps:$4 sm:$0xff]   ;;  %v1670_v32 = vld [vmem:[#allocation8 + $0x1b4] ss:$12 sps:$4 sm:$0xff]   ;;  %v1673_v35 = vld [vmem:[#allocation8 + $0x1c] ss:$12 sps:$4 sm:$0xff]   ;;  %v104_v13 = vlaneseq }
  0x4c   :  { %917 = vmatprep.subr.bf16.mxu0 %v1643_v15  ;;  %958 = vmatprep.subr.bf16.mxu1 %v1646_v16  ;;  %v1676_v36 = vld [vmem:[#allocation8 + $0x19c] ss:$12 sps:$4 sm:$0xff]   ;;  %v1671_v37 = vld [vmem:[#allocation8 + $0x18] ss:$12 sps:$4 sm:$0xff]   ;;  %v1677_v41 = vld [vmem:[#allocation8] ss:$12 sps:$4 sm:$0xff]  }
  0x4d   :  { %v1674_v38 = vld [vmem:[#allocation8 + $0x198] ss:$12 sps:$4 sm:$0xff]   ;;  %v1680_v42 = vld [vmem:[#allocation8 + $0x180] ss:$12 sps:$4 sm:$0xff]   ;;  %v1683_v45 = vld [vmem:[#allocation8 + $0x168] ss:$12 sps:$4 sm:$0xff]  }
  0x4e   :  { %v1679_v39 = vld [vmem:[#allocation8 + $0x4] ss:$12 sps:$4 sm:$0xff]   ;;  %v1685_v43 = vld [vmem:[#allocation8 + $0x16c] ss:$12 sps:$4 sm:$0xff]   ;;  %v1686_v46 = vld [vmem:[#allocation8 + $0x2e8] ss:$12 sps:$4 sm:$0xff]  }
  0x4f   :  { %918 = vmatpush1.bf16.msra.mxu0 %v1641_v17  ;;  %959 = vmatpush1.bf16.msra.mxu1 %v1644_v18  ;;  %v1682_v40 = vld [vmem:[#allocation8 + $0x184] ss:$12 sps:$4 sm:$0xff]   ;;  %v1688_v44 = vld [vmem:[#allocation8 + $0x2ec] ss:$12 sps:$4 sm:$0xff]   ;;  %v1691_v47 = vld [vmem:[#allocation8 + $0x154] ss:$12 sps:$4 sm:$0xff]  }
  0x50   :  { %919 = vmatprep.subr.bf16.mxu0 %v1649_v19  ;;  %960 = vmatprep.subr.bf16.mxu1 %v1652_v20  ;;  %v1694_v48 = vld [vmem:[#allocation8 + $0x2d4] ss:$12 sps:$4 sm:$0xff]   ;;  %v1689_v49 = vld [vmem:[#allocation8 + $0x150] ss:$12 sps:$4 sm:$0xff]   ;;  %v1695_v53 = vld [vmem:[#allocation8 + $0x138] ss:$12 sps:$4 sm:$0xff]  }
  0x51   :  { %v1692_v50 = vld [vmem:[#allocation8 + $0x2d0] ss:$12 sps:$4 sm:$0xff]   ;;  %v1698_v54 = vld [vmem:[#allocation8 + $0x2b8] ss:$12 sps:$4 sm:$0xff]   ;;  %v1701_v57 = vld [vmem:[#allocation8 + $0x120] ss:$12 sps:$4 sm:$0xff]  }
  0x52   :  { %v1697_v51 = vld [vmem:[#allocation8 + $0x13c] ss:$12 sps:$4 sm:$0xff]   ;;  %v1703_v55 = vld [vmem:[#allocation8 + $0x124] ss:$12 sps:$4 sm:$0xff]   ;;  %v1704_v58 = vld [vmem:[#allocation8 + $0x2a0] ss:$12 sps:$4 sm:$0xff]  }
  0x53   :  { %920 = vmatpush1.bf16.msra.mxu0 %v1647_v21  ;;  %961 = vmatpush1.bf16.msra.mxu1 %v1650_v22  ;;  %v1700_v52 = vld [vmem:[#allocation8 + $0x2bc] ss:$12 sps:$4 sm:$0xff]   ;;  %v1706_v56 = vld [vmem:[#allocation8 + $0x2a4] ss:$12 sps:$4 sm:$0xff]   ;;  %v1709_v59 = vld [vmem:[#allocation8 + $0x10c] ss:$12 sps:$4 sm:$0xff]  }
  0x54   :  { %921 = vmatprep.subr.bf16.mxu0 %v1655_v23  ;;  %962 = vmatprep.subr.bf16.mxu1 %v1658_v24  ;;  %v1712_v60 = vld [vmem:[#allocation8 + $0x28c] ss:$12 sps:$4 sm:$0xff]   ;;  %v1707_v61 = vld [vmem:[#allocation8 + $0x108] ss:$12 sps:$4 sm:$0xff]   ;;  %v1713_v1 = vld [vmem:[#allocation8 + $0xf0] ss:$12 sps:$4 sm:$0xff]  }
  0x55   :  { %v1710_v62 = vld [vmem:[#allocation8 + $0x288] ss:$12 sps:$4 sm:$0xff]   ;;  %v1716_v2 = vld [vmem:[#allocation8 + $0x270] ss:$12 sps:$4 sm:$0xff]   ;;  %v1719_v5 = vld [vmem:[#allocation8 + $0xd8] ss:$12 sps:$4 sm:$0xff]  }
  0x56   :  { %v1715_v63 = vld [vmem:[#allocation8 + $0xf4] ss:$12 sps:$4 sm:$0xff]   ;;  %v1721_v3 = vld [vmem:[#allocation8 + $0xdc] ss:$12 sps:$4 sm:$0xff]   ;;  %v1722_v6 = vld [vmem:[#allocation8 + $0x258] ss:$12 sps:$4 sm:$0xff]  }
  0x57   :  { %922 = vmatpush1.bf16.msra.mxu0 %v1653_v25  ;;  %963 = vmatpush1.bf16.msra.mxu1 %v1656_v26  ;;  %v1718_v0 = vld [vmem:[#allocation8 + $0x274] ss:$12 sps:$4 sm:$0xff]   ;;  %v1724_v4 = vld [vmem:[#allocation8 + $0x25c] ss:$12 sps:$4 sm:$0xff]   ;;  %v1727_v7 = vld [vmem:[#allocation8 + $0xc4] ss:$12 sps:$4 sm:$0xff]  }
  0x58   :  { %923 = vmatprep.subr.bf16.mxu0 %v1661_v27  ;;  %964 = vmatprep.subr.bf16.mxu1 %v1664_v28  ;;  %v1730_v8 = vld [vmem:[#allocation8 + $0x244] ss:$12 sps:$4 sm:$0xff]   ;;  %v1725_v9 = vld [vmem:[#allocation8 + $0xc0] ss:$12 sps:$4 sm:$0xff]   ;;  %v1987_v14 = vshrl.u32 %v104_v13, 7  ;;  %s1931_s30 = smov [#allocation11]  }
  0x59   :  { %v1728_v10 = vld [vmem:[#allocation8 + $0x240] ss:$12 sps:$4 sm:$0xff]   ;;  %v1731_v11 = vld [vmem:[#allocation8 + $0x170] ss:$12 sps:$4 sm:$0xff]   ;;  %s1371_s8 = sshll.u32 %s1931_s30, 4  ;;  %s1372_s8 = int_to_ptr.vmem [resolvable:$true] %s1371_s8 }
  0x5a   :  { %v1732_v12 = vld [vmem:[#allocation8 + $0x2f0] ss:$12 sps:$4 sm:$0xff]   ;;  %v106_v15 = vsub.s32 0, %v1987_v14  ;;  %v114_v16 = vsub.s32 2, %v1987_v14  ;;  %v110_v18 = vsub.s32 1, %v1987_v14  ;;  %v118_v19 = vsub.s32 3, %v1987_v14  ;;  %p1894_p12 = scmp.lt.s32.totalorder %s1372_s8, %s1372_s8 }
  0x5b   :  { %924 = vmatpush1.bf16.msra.mxu0 %v1659_v29  ;;  %965 = vmatpush1.bf16.msra.mxu1 %v1662_v30  ;;  %v102_v17 = vld [vmem:[#allocation7] sm:$0xf]  ;;  %v1766_v13 = vld [vmem:[#allocation10 + $0x30] sm:$0xff]   ;;  %s1889_s9 = scalar_lea.vmem %s1372_s8, 128 }
  0x5c   :  { %925 = vmatprep.subr.bf16.mxu0 %v1667_v31  ;;  %966 = vmatprep.subr.bf16.mxu1 %v1670_v32  ;;  %v107_v20 = vrot.slane %v102_v17, %v106_v15  ;;  %v115_v21 = vrot.slane %v102_v17, %v114_v16  ;;  %v111_v22 = vrot.slane %v102_v17, %v110_v18  ;;  %v1488_v14 = vld [vmem:[%s2028_s6] ss:$0 sm:$0xff]  ;;  %p1890_p11 = scmp.ne.s32.totalorder %s1372_s8, %s1889_s9  ;;  %p1895_p13 = scmp.lt.s32.totalorder %s1889_s9, %s1889_s9 }
  0x5d   :  { %v119_v23 = vrot.slane %v102_v17, %v118_v19  ;;  %v1767_v17 = vld [vmem:[#allocation10 + $0x68] sm:$0xff]  }
  0x5e   :  { %v1768_v19 = vld [vmem:[#allocation10 + $0x28] sm:$0xff]   ;;  %p1896_p0 = por %p1895_p13, %p1894_p12 }
  0x5f   :  { %926 = vmatpush1.bf16.msra.mxu0 %v1665_v33  ;;  %967 = vmatpush1.bf16.msra.mxu1 %v1668_v34 }
  0x60   :  { %927 = vmatprep.subr.bf16.mxu0 %v1673_v35  ;;  %968 = vmatprep.subr.bf16.mxu1 %v1676_v36  ;;  %p1897_p1 = pnand %p1896_p0, %p1890_p11 }
  0x63   :  { %928 = vmatpush1.bf16.msra.mxu0 %v1671_v37  ;;  %969 = vmatpush1.bf16.msra.mxu1 %v1674_v38 }
  0x64   :  { %929 = vmatprep.subr.bf16.mxu0 %v1679_v39  ;;  %970 = vmatprep.subr.bf16.mxu1 %v1682_v40 }
  0x67   :  { %930 = vmatpush1.bf16.msra.mxu0 %v1677_v41  ;;  %971 = vmatpush1.bf16.msra.mxu1 %v1680_v42 }
  0x68   :  { %931 = vmatprep.subr.bf16.mxu0 %v1685_v43  ;;  %972 = vmatprep.subr.bf16.mxu1 %v1688_v44  ;;  %v1733_v43 = vld [vmem:[#allocation8 + $0xb0] ss:$12 sps:$4 sm:$0xff]  }
  0x69   :  { %v1734_v44 = vld [vmem:[#allocation8 + $0x230] ss:$12 sps:$4 sm:$0xff]  }
  0x6b   :  { %932 = vmatpush2.bf16.msra.mxu0 %v1683_v45  ;;  %973 = vmatpush2.bf16.msra.mxu1 %v1686_v46  ;;  %v1735_v46 = vld [vmem:[#allocation8 + $0x158] ss:$12 sps:$4 sm:$0xff]  }
  0x6c   :  { %933 = vmatprep.subr.bf16.mxu0 %v1691_v47  ;;  %974 = vmatprep.subr.bf16.mxu1 %v1694_v48  ;;  %v1736_v47 = vld [vmem:[#allocation8 + $0x2d8] ss:$12 sps:$4 sm:$0xff]  }
  0x6d   :  { %v1737_v48 = vld [vmem:[#allocation8 + $0x98] ss:$12 sps:$4 sm:$0xff]  }
  0x6f   :  { %934 = vmatpush2.bf16.msra.mxu0 %v1689_v49  ;;  %975 = vmatpush2.bf16.msra.mxu1 %v1692_v50  ;;  %v1738_v49 = vld [vmem:[#allocation8 + $0x218] ss:$12 sps:$4 sm:$0xff]   ;;  %v1739_v50 = vld [vmem:[#allocation8 + $0x140] ss:$12 sps:$4 sm:$0xff]  }
  0x70   :  { %935 = vmatprep.subr.bf16.mxu0 %v1697_v51  ;;  %976 = vmatprep.subr.bf16.mxu1 %v1700_v52  ;;  %v1740_v51 = vld [vmem:[#allocation8 + $0x2c0] ss:$12 sps:$4 sm:$0xff]  }
  0x71   :  { %v1741_v52 = vld [vmem:[#allocation8 + $0x80] ss:$12 sps:$4 sm:$0xff]  }
  0x73   :  { %936 = vmatpush2.bf16.msra.mxu0 %v1695_v53  ;;  %977 = vmatpush2.bf16.msra.mxu1 %v1698_v54  ;;  %v1742_v53 = vld [vmem:[#allocation8 + $0x200] ss:$12 sps:$4 sm:$0xff]   ;;  %v1743_v54 = vld [vmem:[#allocation8 + $0x128] ss:$12 sps:$4 sm:$0xff]  }
  0x74   :  { %937 = vmatprep.subr.bf16.mxu0 %v1703_v55  ;;  %978 = vmatprep.subr.bf16.mxu1 %v1706_v56  ;;  %v1744_v55 = vld [vmem:[#allocation8 + $0x2a8] ss:$12 sps:$4 sm:$0xff]  }
  0x75   :  { %v1745_v56 = vld [vmem:[#allocation8 + $0x68] ss:$12 sps:$4 sm:$0xff]  }
  0x77   :  { %938 = vmatpush2.bf16.msra.mxu0 %v1701_v57  ;;  %979 = vmatpush2.bf16.msra.mxu1 %v1704_v58  ;;  %v1746_v57 = vld [vmem:[#allocation8 + $0x1e8] ss:$12 sps:$4 sm:$0xff]   ;;  %v1747_v58 = vld [vmem:[#allocation8 + $0x110] ss:$12 sps:$4 sm:$0xff]  }
  0x78   :  { %939 = vmatprep.subr.bf16.mxu0 %v1709_v59  ;;  %980 = vmatprep.subr.bf16.mxu1 %v1712_v60  ;;  %v1748_v59 = vld [vmem:[#allocation8 + $0x290] ss:$12 sps:$4 sm:$0xff]  }
  0x79   :  { %v1749_v60 = vld [vmem:[#allocation8 + $0x50] ss:$12 sps:$4 sm:$0xff]  }
  0x7b   :  { %940 = vmatpush2.bf16.msra.mxu0 %v1707_v61  ;;  %981 = vmatpush2.bf16.msra.mxu1 %v1710_v62  ;;  %v1750_v61 = vld [vmem:[#allocation8 + $0x1d0] ss:$12 sps:$4 sm:$0xff]   ;;  %v1751_v62 = vld [vmem:[#allocation8 + $0xf8] ss:$12 sps:$4 sm:$0xff]  }
  0x7c   :  { %941 = vmatprep.subr.bf16.mxu0 %v1715_v63  ;;  %982 = vmatprep.subr.bf16.mxu1 %v1718_v0  ;;  %v1752_v63 = vld [vmem:[#allocation8 + $0x278] ss:$12 sps:$4 sm:$0xff]  }
  0x7d   :  { %v1753_v0 = vld [vmem:[#allocation8 + $0x38] ss:$12 sps:$4 sm:$0xff]  }
  0x7f   :  { %942 = vmatpush2.bf16.msra.mxu0 %v1713_v1  ;;  %983 = vmatpush2.bf16.msra.mxu1 %v1716_v2  ;;  %v1754_v1 = vld [vmem:[#allocation8 + $0x1b8] ss:$12 sps:$4 sm:$0xff]   ;;  %v1755_v2 = vld [vmem:[#allocation8 + $0xe0] ss:$12 sps:$4 sm:$0xff]  }
  0x80   :  { %943 = vmatprep.subr.bf16.mxu0 %v1721_v3  ;;  %984 = vmatprep.subr.bf16.mxu1 %v1724_v4  ;;  %v1756_v3 = vld [vmem:[#allocation8 + $0x260] ss:$12 sps:$4 sm:$0xff]  }
  0x81   :  { %v1757_v4 = vld [vmem:[#allocation8 + $0x20] ss:$12 sps:$4 sm:$0xff]  }
  0x83   :  { %944 = vmatpush2.bf16.msra.mxu0 %v1719_v5  ;;  %985 = vmatpush2.bf16.msra.mxu1 %v1722_v6  ;;  %v1758_v5 = vld [vmem:[#allocation8 + $0x1a0] ss:$12 sps:$4 sm:$0xff]   ;;  %v1759_v6 = vld [vmem:[#allocation8 + $0xc8] ss:$12 sps:$4 sm:$0xff]  }
  0x84   :  { %945 = vmatprep.subr.bf16.mxu0 %v1727_v7  ;;  %986 = vmatprep.subr.bf16.mxu1 %v1730_v8  ;;  %v1760_v7 = vld [vmem:[#allocation8 + $0x248] ss:$12 sps:$4 sm:$0xff]  }
  0x85   :  { %v1761_v8 = vld [vmem:[#allocation8 + $0x8] ss:$12 sps:$4 sm:$0xff]  }
  0x87   :  { %946 = vmatpush2.bf16.msra.mxu0 %v1725_v9  ;;  %987 = vmatpush2.bf16.msra.mxu1 %v1728_v10  ;;  %v1762_v9 = vld [vmem:[#allocation8 + $0x188] ss:$12 sps:$4 sm:$0xff]   ;;  %v1763_v10 = vld [vmem:[#allocation10 + $0x78] sm:$0xff]  }
  0x88   :  { %1513 = vmatprep.subr.bf16.mxu0 %v1731_v11  ;;  %1535 = vmatprep.subr.bf16.mxu1 %v1732_v12  ;;  %v1764_v11 = vld [vmem:[#allocation10 + $0x38] sm:$0xff]   ;;  %v1765_v12 = vld [vmem:[#allocation10 + $0x70] sm:$0xff]  }
 0x10a   :  { %v202_v24 = vpop.f32.mrf.mxu0  ;;  %v243_v25 = vpop.f32.mrf.mxu1 }
 0x10b   :  { %v203_v26 = vadd.f32 %v202_v24, %v107_v20  ;;  %v244_v27 = vadd.f32 %v243_v25, %v115_v21  ;;  %v1769_v20 = vld [vmem:[#allocation10 + $0x60] sm:$0xff]   ;;  %v1773_v24 = vld [vmem:[#allocation10 + $0x50] sm:$0xff]  }
 0x10c   :  { %v204_v28 = vpop.f32.mrf.mxu0  ;;  %v245_v29 = vpop.f32.mrf.mxu1  ;;  %v1770_v21 = vld [vmem:[#allocation10 + $0x20] sm:$0xff]   ;;  %v1774_v25 = vld [vmem:[#allocation10 + $0x10] sm:$0xff]  }
 0x10d   :  { %v252_v30 = vmax.f32 %v244_v27, 0.0  ;;  %v205_v31 = vadd.f32 %v204_v28, %v111_v22  ;;  %v246_v32 = vadd.f32 %v245_v29, %v119_v23  ;;  %v250_v33 = vmax.f32 %v203_v26, 0.0  ;;  %v1771_v22 = vld [vmem:[#allocation10 + $0x58] sm:$0xff]   ;;  %v1775_v26 = vld [vmem:[#allocation10 + $0x48] sm:$0xff]   ;;  %v1777_v28 = vld [vmem:[#allocation10 + $0x40] sm:$0xff]  }
 0x10e   :  { %v206_v34 = vpop.f32.mrf.mxu0  ;;  %v247_v35 = vpop.f32.mrf.mxu1  ;;  %v1772_v23 = vld [vmem:[#allocation10 + $0x18] sm:$0xff]   ;;  %v1776_v27 = vld [vmem:[#allocation10 + $0x8] sm:$0xff]   ;;  %v1778_v29 = vld [vmem:[#allocation10] sm:$0xff]  }
 0x10f   :  { %v251_v36 = vmax.f32 %v205_v31, 0.0  ;;  %v253_v37 = vmax.f32 %v246_v32, 0.0  ;;  %v1999_v38 = vpack.c.bf16 %v252_v30, %v252_v30  ;;  %v2001_v45 = vpack.c.bf16 %v250_v33, %v250_v33  ;;  %v1779_v30 = vld [vmem:[#allocation10 + $0xb8] sm:$0xff]   ;;  %v1780_v32 = vld [vmem:[#allocation10 + $0xb0] sm:$0xff]   ;;  %v1781_v33 = vld [vmem:[#allocation10 + $0xa8] sm:$0xff]  }
 0x110   :  { %v207_v39 = vpop.f32.mrf.mxu0  ;;  %v248_v40 = vpop.f32.mrf.mxu1  ;;  %v1929_v31 = vmov 0.0   ;;  %v1782_v34 = vld [vmem:[#allocation10 + $0xa0] sm:$0xff]   ;;  %v1783_v35 = vld [vmem:[#allocation10 + $0x98] sm:$0xff]  }
 0x111   :  { %v255_v41 = vpack.c.bf16 %v251_v36, %v251_v36  ;;  %v257_v42 = vpack.c.bf16 %v253_v37, %v253_v37  ;;  %v1784_v36 = vld [vmem:[#allocation10 + $0x90] sm:$0xff]   ;;  %v1785_v37 = vld [vmem:[#allocation10 + $0x88] sm:$0xff]  }
 0x112   :  { %v386_v39 = vld [vmem:[%s2026_s4] sm:$0x7] }
 0x113   :  { %947 = vmatprep.mubr.bf16.mxu0 %v255_v41  ;;  %988 = vmatprep.mubr.bf16.mxu1 %v257_v42  ;;  %v391_v40 = vrot.slane %v386_v39, %v106_v15 }
 0x114   :  { %948 = vmatmul.mubr.bf16.vlgmr.msra.gmra.mxu0 %v2001_v45  ;;  %989 = vmatmul.mubr.bf16.vlgmr.msra.gmra.mxu1 %v1999_v38 }
 0x115   :  { %1514 = vmatpush3.bf16.msra.mxu0 %v1733_v43  ;;  %1536 = vmatpush3.bf16.msra.mxu1 %v1734_v44 }
 0x116   :  { %1029 = vmatprep.mubr.bf16.mxu0 %v255_v41  ;;  %1069 = vmatprep.mubr.bf16.mxu1 %v257_v42  ;;  %v395_v41 = vrot.slane %v386_v39, %v110_v18 }
 0x117   :  { %1515 = vmatprep.subr.bf16.mxu0 %v1735_v46  ;;  %1537 = vmatprep.subr.bf16.mxu1 %v1736_v47 }
 0x119   :  { %1516 = vmatpush3.bf16.msra.mxu0 %v1737_v48  ;;  %1538 = vmatpush3.bf16.msra.mxu1 %v1738_v49 }
 0x11a   :  { %1517 = vmatprep.subr.bf16.mxu0 %v1739_v50  ;;  %1539 = vmatprep.subr.bf16.mxu1 %v1740_v51 }
 0x11d   :  { %1518 = vmatpush3.bf16.msra.mxu0 %v1741_v52  ;;  %1540 = vmatpush3.bf16.msra.mxu1 %v1742_v53 }
 0x11e   :  { %1519 = vmatprep.subr.bf16.mxu0 %v1743_v54  ;;  %1541 = vmatprep.subr.bf16.mxu1 %v1744_v55 }
 0x121   :  { %1520 = vmatpush3.bf16.msra.mxu0 %v1745_v56  ;;  %1542 = vmatpush3.bf16.msra.mxu1 %v1746_v57 }
 0x122   :  { %1521 = vmatprep.subr.bf16.mxu0 %v1747_v58  ;;  %1543 = vmatprep.subr.bf16.mxu1 %v1748_v59  ;;  %v399_v58 = vrot.slane %v386_v39, %v114_v16 }
 0x125   :  { %1522 = vmatpush3.bf16.msra.mxu0 %v1749_v60  ;;  %1544 = vmatpush3.bf16.msra.mxu1 %v1750_v61 }
 0x126   :  { %1523 = vmatprep.subr.bf16.mxu0 %v1751_v62  ;;  %1545 = vmatprep.subr.bf16.mxu1 %v1752_v63 }
 0x129   :  { %1524 = vmatpush3.bf16.msra.mxu0 %v1753_v0  ;;  %1546 = vmatpush3.bf16.msra.mxu1 %v1754_v1 }
 0x12a   :  { %1525 = vmatprep.subr.bf16.mxu0 %v1755_v2  ;;  %1547 = vmatprep.subr.bf16.mxu1 %v1756_v3 }
 0x12d   :  { %1526 = vmatpush3.bf16.msra.mxu0 %v1757_v4  ;;  %1548 = vmatpush3.bf16.msra.mxu1 %v1758_v5 }
 0x12e   :  { %1527 = vmatprep.subr.bf16.mxu0 %v1759_v6  ;;  %1549 = vmatprep.subr.bf16.mxu1 %v1760_v7 }
 0x131   :  { %1528 = vmatpush3.bf16.msra.mxu0 %v1761_v8  ;;  %1550 = vmatpush3.bf16.msra.mxu1 %v1762_v9 }
 0x132   :  { %1557 = vmatprep.subr.bf16.mxu0 %v1763_v10  ;;  %1588 = vmatprep.subr.bf16.mxu1 %v1929_v31 }
 0x134   :  { %1030 = vmatmul.mubr.bf16.vlgmr.msra.gmra.mxu0 %v2001_v45  ;;  %1070 = vmatmul.mubr.bf16.vlgmr.msra.gmra.mxu1 %v1999_v38  ;;  %v1786_v38 = vld [vmem:[#allocation10 + $0x80] sm:$0xff]  }
 0x135   :  { %1558 = vmatpush3.bf16.msra.mxu0 %v1764_v11  ;;  %1589 = vmatpush3.bf16.msra.mxu1 %v1779_v30 }
 0x136   :  { %1559 = vmatprep.subr.bf16.mxu0 %v1765_v12  ;;  %1590 = vmatprep.subr.bf16.mxu1 %v1929_v31 }
 0x137   :  { %1604 = vmatprep.mubr.msk.bf16.mxu1 %vm1930_vm1, %v1929_v31 }
 0x139   :  { %1560 = vmatpush3.bf16.msra.mxu0 %v1766_v13  ;;  %1591 = vmatpush3.bf16.msra.mxu1 %v1780_v32 }
 0x13a   :  { %1561 = vmatprep.subr.bf16.mxu0 %v1767_v17  ;;  %1592 = vmatprep.subr.bf16.mxu1 %v1929_v31 }
 0x13d   :  { %1562 = vmatpush3.bf16.msra.mxu0 %v1768_v19  ;;  %1593 = vmatpush3.bf16.msra.mxu1 %v1781_v33 }
 0x13e   :  { %1563 = vmatprep.subr.bf16.mxu0 %v1769_v20  ;;  %1594 = vmatprep.subr.bf16.mxu1 %v1929_v31 }
 0x141   :  { %1564 = vmatpush3.bf16.msra.mxu0 %v1770_v21  ;;  %1595 = vmatpush3.bf16.msra.mxu1 %v1782_v34 }
 0x142   :  { %1565 = vmatprep.subr.bf16.mxu0 %v1771_v22  ;;  %1596 = vmatprep.subr.bf16.mxu1 %v1929_v31 }
 0x145   :  { %1566 = vmatpush3.bf16.msra.mxu0 %v1772_v23  ;;  %1597 = vmatpush3.bf16.msra.mxu1 %v1783_v35 }
 0x146   :  { %1567 = vmatprep.subr.bf16.mxu0 %v1773_v24  ;;  %1598 = vmatprep.subr.bf16.mxu1 %v1929_v31 }
 0x149   :  { %1568 = vmatpush3.bf16.msra.mxu0 %v1774_v25  ;;  %1599 = vmatpush3.bf16.msra.mxu1 %v1784_v36 }
 0x14a   :  { %1569 = vmatprep.subr.bf16.mxu0 %v1775_v26  ;;  %1600 = vmatprep.subr.bf16.mxu1 %v1929_v31 }
 0x14d   :  { %1570 = vmatpush3.bf16.msra.mxu0 %v1776_v27  ;;  %1601 = vmatpush3.bf16.msra.mxu1 %v1785_v37 }
 0x14e   :  { %1571 = vmatprep.subr.bf16.mxu0 %v1777_v28  ;;  %1602 = vmatprep.subr.bf16.mxu1 %v1929_v31 }
 0x151   :  { %1572 = vmatpush3.bf16.msra.mxu0 %v1778_v29  ;;  %1603 = vmatpush3.bf16.msra.mxu1 %v1786_v38 }
 0x1d4   :  { %v949_v42 = vpop.f32.mrf.mxu0  ;;  %v990_v43 = vpop.f32.mrf.mxu1 }
 0x1d5   :  { %v950_v44 = vadd.f32 %v949_v42, %v391_v40 }
 0x1d6   :  { %v951_v45 = vpop.f32.mrf.mxu0  ;;  %v992_v46 = vpop.f32.mrf.mxu1 }
 0x1d7   :  { %v991_v47 = vadd.f32 %v990_v43, %v950_v44  ;;  %v952_v48 = vadd.f32 %v951_v45, %v395_v41 }
 0x1d8   :  { %v953_v49 = vpop.f32.mrf.mxu0  ;;  %v994_v50 = vpop.f32.mrf.mxu1 }
 0x1d9   :  { %v993_v51 = vadd.f32 %v992_v46, %v952_v48  ;;  %v1077_v52 = vmax.f32 %v991_v47, 0.0 }
 0x1da   :  { %v954_v53 = vpop.f32.mrf.mxu0  ;;  %v995_v54 = vpop.f32.mrf.mxu1 }
 0x1db   :  { %v1078_v55 = vmax.f32 %v993_v51, 0.0  ;;  %v1080_v57 = vpack.c.bf16 %v1077_v52, %v1077_v52 }
 0x1dd   :  { %v1081_v56 = vpack.c.bf16 %v1078_v55, %v1078_v55 }
 0x1df   :  { %1314 = vmatprep.mubr.bf16.mxu0 %v1081_v56 }
 0x1e0   :  { %1315 = vmatmul.mubr.bf16.vlgmr.msra.gmra.mxu0 %v1080_v57 }
 0x1f4   :  { %v1529_v15 = vpop.f32.mrf.mxu0  ;;  %v1551_v18 = vpop.f32.mrf.mxu1 }
 0x1f6   :  { %v1530_v59 = vpop.f32.mrf.mxu0  ;;  %v1552_v60 = vpop.f32.mrf.mxu1 }
 0x1f7   :  { %v1531_v61 = vadd.f32 %v1530_v59, %v1529_v15  ;;  %v1553_v1 = vadd.f32 %v1552_v60, %v1551_v18 }
 0x1f8   :  { %v1532_v62 = vpop.f32.mrf.mxu0  ;;  %v1554_v63 = vpop.f32.mrf.mxu1 }
 0x1f9   :  { %v1032_v0 = vadd.f32 %v1531_v61, %v399_v58 }
 0x1fa   :  { %v1533_v2 = vpop.f32.mrf.mxu0  ;;  %v1555_v3 = vpop.f32.mrf.mxu1 }
 0x1fb   :  { %v1072_v4 = vadd.f32 %v1553_v1, %v1032_v0 }
 0x1fd   :  { %v1079_v5 = vmax.f32 %v1072_v4, 0.0 }
 0x1ff   :  { %v1082_v6 = vpack.c.bf16 %v1079_v5, %v1079_v5 }
 0x201   :  { %1605 = vmatmul.mubr.bf16.vlgmr.msra.gmra.mxu1 %v1082_v6 }
 0x2a0   :  { %v1573_v7 = vpop.f32.mrf.mxu0 }
 0x2a2   :  { %v1574_v8 = vpop.f32.mrf.mxu0 }
 0x2a3   :  { %v1575_v11 = vadd.f32 %v1574_v8, %v1573_v7 }
 0x2a4   :  { %v1576_v9 = vpop.f32.mrf.mxu0 }
 0x2a5   :  { %v1317_v16 = vadd.f32 %v1575_v11, %v1488_v14 }
 0x2a6   :  { %v1577_v10 = vpop.f32.mrf.mxu0 }
 0x2c1   :  { %v1356_v12 = vpop.f32.mrf.mxu1 }
 0x2c2   :  { %v1357_v13 = vadd.f32 %v1356_v12, %v1317_v16 }
 0x2c3   :  { %v1606_v17 = vpop.f32.mrf.mxu1 }
 0x2c4   :  { %1787 = vtanh.f32 %v1357_v13 }
 0x2c5   :  { %v1359_v19 = vpop.f32.mrf.mxu1 }
 0x2c7   :  { %v1607_v20 = vpop.f32.mrf.mxu1 }
 0x2d1   :  { %v1788_v21 = vpop.eup %1787 }
 0x2d2   :  { %v1363_v22 = vmul.f32 2.0, %v1788_v21 }
 0x2d4   :  { %1364 = vst [vmem:[#allocation11] sm:$0xff] %v1363_v22 }
 0x2d5   :  { %1900 = shalt.err (!%p1897_p1)
}
 0x2d6   :  { %1374 = dma.vmem_to_hbm [thread:$0]  %s1372_s8, 128, %s2029_s7, [#allocation4]  }
 0x2d7   :  { %1915 = dma.done.wait [#allocation4], 128  }
 0x2d8   :  { %1916 = vsyncadd [#allocation4], 4294967168 }
 0x2d9   :  { %1378 = vsyncpa [#allocation3], 1 }
 0x2da   :  { %1379 = vsyncpa [#allocation6], 1 }
 0x2db   :  { %1380 = vsyncpa [#allocation9], 1 }
 0x2dc   :  { %1381 = vsyncpa [#allocation4], 1 }

// kernel: tpu_custom_call.1
= control target key start
LH: loop header
LB: loop body
LE: loop exit
PB: predicated region body
PF: predicated region fallthrough
CT: control target
= control target key end

     0   :  { %12 = vsyncpa [#allocation3], 0  ;;  %s2022_s0 = inlined_call_operand.hbm [shape: f32[8,32], index: 0, kind: input, shape index: {}]   ;;  %s2023_s1 = inlined_call_operand.hbm [shape: bf16[32,512], index: 1, kind: input, shape index: {}]   ;;  %s2024_s2 = inlined_call_operand.hbm [shape: f32[1,512], index: 2, kind: input, shape index: {}]   ;;  %s2025_s3 = inlined_call_operand.hbm [shape: bf16[512,384], index: 3, kind: input, shape index: {}]   ;;  %s2026_s4 = inlined_call_operand.vmem [shape: f32[1,384], index: 4, kind: input, shape index: {}]   ;;  %s2027_s5 = inlined_call_operand.hbm [shape: bf16[384,128], index: 5, kind: input, shape index: {}]   ;;  %s2028_s6 = inlined_call_operand.vmem [shape: f32[1,128], index: 6, kind: input, shape index: {}]   ;;  %s2029_s7 = inlined_call_operand.hbm [shape: f32[8,128], index: 7, kind: output, shape index: {}]  }
   0x1   :  { %13 = vsyncpa [#allocation6], 0 }
   0x2   :  { %14 = vsyncpa [#allocation9], 0 }
   0x3   :  { %15 = vsyncpa [#allocation4], 0  ;;  %s1917_s24 = smov [#allocation5]  }
   0x4   :  { %s31_s25 = sshll.u32 %s1917_s24, 4  ;;  %s32_s25 = int_to_ptr.vmem [resolvable:$true] %s31_s25 }
   0x5   :  { %s1797_s26 = scalar_lea.vmem %s32_s25, 1024  ;;  %p1802_p1 = scmp.lt.s32.totalorder %s32_s25, %s32_s25 }
   0x6   :  { %p1798_p0 = scmp.ne.s32.totalorder %s32_s25, %s1797_s26  ;;  %p1803_p2 = scmp.lt.s32.totalorder %s1797_s26, %s1797_s26 }
   0x8   :  { %p1804_p3 = por %p1803_p2, %p1802_p1 }
   0xa   :  { %p1805_p4 = pnand %p1804_p3, %p1798_p0 }
   0xc   :  { %1808 = shalt.err (!%p1805_p4)
}
   0xd   :  { %s1918_s27 = smov 256   ;;  %s1919_s28 = smov 16  }
   0xe   :  { %37 = dma.hbm_to_vmem [thread:$0]  %s2023_s1, 1024, %s32_s25, [#allocation6], %s1918_s27, %s1918_s27, %s1919_s28  }
   0xf   :  { %s1920_s8 = smov [#allocation8]  }
  0x10   :  { %s53_s9 = sshll.u32 %s1920_s8, 4  ;;  %s54_s9 = int_to_ptr.vmem [resolvable:$true] %s53_s9 }
  0x11   :  { %s1817_s10 = scalar_lea.vmem %s54_s9, 12288  ;;  %p1822_p6 = scmp.lt.s32.totalorder %s54_s9, %s54_s9 }
  0x12   :  { %p1818_p5 = scmp.ne.s32.totalorder %s54_s9, %s1817_s10  ;;  %p1823_p7 = scmp.lt.s32.totalorder %s1817_s10, %s1817_s10 }
  0x14   :  { %p1824_p8 = por %p1823_p7, %p1822_p6 }
  0x16   :  { %p1825_p9 = pnand %p1824_p8, %p1818_p5 }
  0x18   :  { %1828 = shalt.err (!%p1825_p9)
}
  0x19   :  { %s1921_s11 = smov 192   ;;  %s1922_s12 = smov 12  }
  0x1a   :  { %59 = dma.hbm_to_vmem [thread:$0]  %s2025_s3, 12288, %s54_s9, [#allocation9], %s1921_s11, %s1921_s11, %s1922_s12  }
  0x1b   :  { %s1923_s15 = smov [#allocation2]   ;;  %s1924_s17 = smov [#allocation7]  }
  0x1c   :  { %s22_s16 = sshll.u32 %s1923_s15, 4  ;;  %s44_s1 = sshll.u32 %s1924_s17, 4  ;;  %s23_s16 = int_to_ptr.vmem [resolvable:$true] %s22_s16  ;;  %s45_s1 = int_to_ptr.vmem [resolvable:$true] %s44_s1 }
  0x1d   :  { %s1837_s18 = scalar_lea.vmem %s23_s16, 128  ;;  %p1842_p11 = scmp.lt.s32.totalorder %s23_s16, %s23_s16 }
  0x1e   :  { %p1838_p10 = scmp.ne.s32.totalorder %s23_s16, %s1837_s18  ;;  %p1843_p12 = scmp.lt.s32.totalorder %s1837_s18, %s1837_s18 }
  0x20   :  { %p1844_p13 = por %p1843_p12, %p1842_p11 }
  0x22   :  { %p1845_p0 = pnand %p1844_p13, %p1838_p10 }
  0x24   :  { %1848 = shalt.err (!%p1845_p0)
}
  0x25   :  { %25 = dma.hbm_to_vmem [thread:$0]  %s2022_s0, 128, %s23_s16, [#allocation3]  }
  0x26   :  { %s1857_s21 = scalar_lea.vmem %s45_s1, 64  ;;  %p1862_p2 = scmp.lt.s32.totalorder %s45_s1, %s45_s1 }
  0x27   :  { %p1858_p1 = scmp.ne.s32.totalorder %s45_s1, %s1857_s21  ;;  %p1863_p3 = scmp.lt.s32.totalorder %s1857_s21, %s1857_s21 }
  0x29   :  { %p1864_p4 = por %p1863_p3, %p1862_p2 }
  0x2b   :  { %p1865_p5 = pnand %p1864_p4, %p1858_p1 }
  0x2d   :  { %1868 = shalt.err (!%p1865_p5)
}
  0x2e   :  { %47 = dma.hbm_to_vmem [thread:$0]  %s2024_s2, 64, %s45_s1, [#allocation6]  }
  0x2f   :  { %s1925_s23 = smov [#allocation10]  }
  0x30   :  { %s67_s24 = sshll.u32 %s1925_s23, 4  ;;  %s68_s24 = int_to_ptr.vmem [resolvable:$true] %s67_s24 }
  0x31   :  { %s1877_s25 = scalar_lea.vmem %s68_s24, 3072  ;;  %p1882_p7 = scmp.lt.s32.totalorder %s68_s24, %s68_s24 }
  0x32   :  { %p1878_p6 = scmp.ne.s32.totalorder %s68_s24, %s1877_s25  ;;  %p1883_p8 = scmp.lt.s32.totalorder %s1877_s25, %s1877_s25 }
  0x34   :  { %p1884_p9 = por %p1883_p8, %p1882_p7 }
  0x36   :  { %p1885_p10 = pnand %p1884_p9, %p1878_p6 }
  0x38   :  { %1888 = shalt.err (!%p1885_p10)
}
  0x39   :  { %s1926_s0 = smov 64   ;;  %s1927_s26 = smov 4  }
  0x3a   :  { %73 = dma.hbm_to_vmem [thread:$0]  %s2027_s5, 3072, %s68_s24, [#allocation9], %s1926_s0, %s1926_s0, %s1927_s26  }
  0x3b   :  { %1909 = dma.done.wait [#allocation3], 128  }
  0x3c   :  { %1910 = vsyncadd [#allocation3], 4294967168 }
  0x3d   :  { %1911 = dma.done.wait [#allocation6], 1088  }
  0x3e   :  { %1912 = vsyncadd [#allocation6], 4294966208 }
  0x3f   :  { %1913 = dma.done.wait [#allocation9], 15360  }
  0x40   :  { %1914 = vsyncadd [#allocation9], 4294951936  ;;  %v1928_v0 = vmov 0   ;;  %v1623_v1 = vld [vmem:[#allocation5 + $0x24] ss:$16 sps:$4 sm:$0xff]   ;;  %v92_v9 = vld [vmem:[#allocation2] sm:$0xff] }
  0x41   :  { %200 = vmatprep.mubr.bf16.mxu0 %v1928_v0  ;;  %241 = vmatprep.mubr.bf16.mxu1 %v1928_v0  ;;  %v1625_v2 = vld [vmem:[#allocation5 + $0x2c] ss:$16 sps:$4 sm:$0xff]   ;;  %v1627_v3 = vld [vmem:[#allocation5 + $0x20] ss:$16 sps:$4 sm:$0xff]   ;;  %v1628_v4 = vld [vmem:[#allocation5 + $0x28] ss:$16 sps:$4 sm:$0xff]   ;;  %v93_v12 = vpack.c.bf16 %v92_v9, %v92_v9 }
  0x42   :  { %180 = vmatprep.subr.bf16.mxu0 %v1623_v1  ;;  %221 = vmatprep.subr.bf16.mxu1 %v1625_v2  ;;  %v1629_v5 = vld [vmem:[#allocation5 + $0x4] ss:$16 sps:$4 sm:$0xff]   ;;  %v1631_v6 = vld [vmem:[#allocation5 + $0xc] ss:$16 sps:$4 sm:$0xff]   ;;  %v1633_v7 = vld [vmem:[#allocation5] ss:$16 sps:$4 sm:$0xff]  }
  0x43   :  { %181 = vmatpush1.bf16.msra.mxu0 %v1627_v3  ;;  %222 = vmatpush1.bf16.msra.mxu1 %v1628_v4  ;;  %v1634_v8 = vld [vmem:[#allocation5 + $0x8] ss:$16 sps:$4 sm:$0xff]   ;;  %v1637_v11 = vld [vmem:[#allocation8 + $0xac] ss:$12 sps:$4 sm:$0xff]   ;;  %vm164_vm0 = vcmask 261120   ;;  %vm1930_vm1 = vmmov 0  }
  0x44   :  { %182 = vmatprep.subr.bf16.mxu0 %v1629_v5  ;;  %223 = vmatprep.subr.bf16.mxu1 %v1631_v6  ;;  %v1635_v10 = vld [vmem:[#allocation8 + $0xa8] ss:$12 sps:$4 sm:$0xff]   ;;  %v1640_v14 = vld [vmem:[#allocation8 + $0x22c] ss:$12 sps:$4 sm:$0xff]   ;;  %v1641_v17 = vld [vmem:[#allocation8 + $0x90] ss:$12 sps:$4 sm:$0xff]  }
  0x45   :  { %v1638_v13 = vld [vmem:[#allocation8 + $0x228] ss:$12 sps:$4 sm:$0xff]   ;;  %v1644_v18 = vld [vmem:[#allocation8 + $0x210] ss:$12 sps:$4 sm:$0xff]   ;;  %v1647_v21 = vld [vmem:[#allocation8 + $0x78] ss:$12 sps:$4 sm:$0xff]  }
  0x46   :  { %v1643_v15 = vld [vmem:[#allocation8 + $0x94] ss:$12 sps:$4 sm:$0xff]   ;;  %v1649_v19 = vld [vmem:[#allocation8 + $0x7c] ss:$12 sps:$4 sm:$0xff]   ;;  %v1650_v22 = vld [vmem:[#allocation8 + $0x1f8] ss:$12 sps:$4 sm:$0xff]  }
  0x47   :  { %183 = vmatpush1.bf16.msra.mxu0 %v1633_v7  ;;  %224 = vmatpush1.bf16.msra.mxu1 %v1634_v8  ;;  %v1646_v16 = vld [vmem:[#allocation8 + $0x214] ss:$12 sps:$4 sm:$0xff]   ;;  %v1652_v20 = vld [vmem:[#allocation8 + $0x1fc] ss:$12 sps:$4 sm:$0xff]   ;;  %v1655_v23 = vld [vmem:[#allocation8 + $0x64] ss:$12 sps:$4 sm:$0xff]  }
  0x48   :  { %915 = vmatprep.subr.bf16.mxu0 %v1637_v11  ;;  %956 = vmatprep.subr.bf16.mxu1 %v1640_v14  ;;  %v1658_v24 = vld [vmem:[#allocation8 + $0x1e4] ss:$12 sps:$4 sm:$0xff]   ;;  %v1653_v25 = vld [vmem:[#allocation8 + $0x60] ss:$12 sps:$4 sm:$0xff]   ;;  %v1659_v29 = vld [vmem:[#allocation8 + $0x48] ss:$12 sps:$4 sm:$0xff]  }
  0x49   :  { %v1656_v26 = vld [vmem:[#allocation8 + $0x1e0] ss:$12 sps:$4 sm:$0xff]   ;;  %v1662_v30 = vld [vmem:[#allocation8 + $0x1c8] ss:$12 sps:$4 sm:$0xff]   ;;  %v1665_v33 = vld [vmem:[#allocation8 + $0x30] ss:$12 sps:$4 sm:$0xff]  }
  0x4a   :  { %1390 = vmatmul.mubr.msk.bf16.vlgmr.msra.gmra.mxu0 %vm164_vm0, %v93_v12  ;;  %1391 = vmatmul.mubr.msk.bf16.vlgmr.msra.gmra.mxu1 %vm164_vm0, %v93_v12  ;;  %v1661_v27 = vld [vmem:[#allocation8 + $0x4c] ss:$12 sps:$4 sm:$0xff]   ;;  %v1667_v31 = vld [vmem:[#allocation8 + $0x34] ss:$12 sps:$4 sm:$0xff]   ;;  %v1668_v34 = vld [vmem:[#allocation8 + $0x1b0] ss:$12 sps:$4 sm:$0xff]  }
  0x4b   :  { %916 = vmatpush1.bf16.msra.mxu0 %v1635_v10  ;;  %957 = vmatpush1.bf16.msra.mxu1 %v1638_v13  ;;  %v1664_v28 = vld [vmem:[#allocation8 + $0x1cc] ss:$12 sps:$4 sm:$0xff]   ;;  %v1670_v32 = vld [vmem:[#allocation8 + $0x1b4] ss:$12 sps:$4 sm:$0xff]   ;;  %v1673_v35 = vld [vmem:[#allocation8 + $0x1c] ss:$12 sps:$4 sm:$0xff]   ;;  %v104_v13 = vlaneseq }
  0x4c   :  { %917 = vmatprep.subr.bf16.mxu0 %v1643_v15  ;;  %958 = vmatprep.subr.bf16.mxu1 %v1646_v16  ;;  %v1676_v36 = vld [vmem:[#allocation8 + $0x19c] ss:$12 sps:$4 sm:$0xff]   ;;  %v1671_v37 = vld [vmem:[#allocation8 + $0x18] ss:$12 sps:$4 sm:$0xff]   ;;  %v1677_v41 = vld [vmem:[#allocation8] ss:$12 sps:$4 sm:$0xff]  }
  0x4d   :  { %v1674_v38 = vld [vmem:[#allocation8 + $0x198] ss:$12 sps:$4 sm:$0xff]   ;;  %v1680_v42 = vld [vmem:[#allocation8 + $0x180] ss:$12 sps:$4 sm:$0xff]   ;;  %v1683_v45 = vld [vmem:[#allocation8 + $0x168] ss:$12 sps:$4 sm:$0xff]  }
  0x4e   :  { %v1679_v39 = vld [vmem:[#allocation8 + $0x4] ss:$12 sps:$4 sm:$0xff]   ;;  %v1685_v43 = vld [vmem:[#allocation8 + $0x16c] ss:$12 sps:$4 sm:$0xff]   ;;  %v1686_v46 = vld [vmem:[#allocation8 + $0x2e8] ss:$12 sps:$4 sm:$0xff]  }
  0x4f   :  { %918 = vmatpush1.bf16.msra.mxu0 %v1641_v17  ;;  %959 = vmatpush1.bf16.msra.mxu1 %v1644_v18  ;;  %v1682_v40 = vld [vmem:[#allocation8 + $0x184] ss:$12 sps:$4 sm:$0xff]   ;;  %v1688_v44 = vld [vmem:[#allocation8 + $0x2ec] ss:$12 sps:$4 sm:$0xff]   ;;  %v1691_v47 = vld [vmem:[#allocation8 + $0x154] ss:$12 sps:$4 sm:$0xff]  }
  0x50   :  { %919 = vmatprep.subr.bf16.mxu0 %v1649_v19  ;;  %960 = vmatprep.subr.bf16.mxu1 %v1652_v20  ;;  %v1694_v48 = vld [vmem:[#allocation8 + $0x2d4] ss:$12 sps:$4 sm:$0xff]   ;;  %v1689_v49 = vld [vmem:[#allocation8 + $0x150] ss:$12 sps:$4 sm:$0xff]   ;;  %v1695_v53 = vld [vmem:[#allocation8 + $0x138] ss:$12 sps:$4 sm:$0xff]  }
  0x51   :  { %v1692_v50 = vld [vmem:[#allocation8 + $0x2d0] ss:$12 sps:$4 sm:$0xff]   ;;  %v1698_v54 = vld [vmem:[#allocation8 + $0x2b8] ss:$12 sps:$4 sm:$0xff]   ;;  %v1701_v57 = vld [vmem:[#allocation8 + $0x120] ss:$12 sps:$4 sm:$0xff]  }
  0x52   :  { %v1697_v51 = vld [vmem:[#allocation8 + $0x13c] ss:$12 sps:$4 sm:$0xff]   ;;  %v1703_v55 = vld [vmem:[#allocation8 + $0x124] ss:$12 sps:$4 sm:$0xff]   ;;  %v1704_v58 = vld [vmem:[#allocation8 + $0x2a0] ss:$12 sps:$4 sm:$0xff]  }
  0x53   :  { %920 = vmatpush1.bf16.msra.mxu0 %v1647_v21  ;;  %961 = vmatpush1.bf16.msra.mxu1 %v1650_v22  ;;  %v1700_v52 = vld [vmem:[#allocation8 + $0x2bc] ss:$12 sps:$4 sm:$0xff]   ;;  %v1706_v56 = vld [vmem:[#allocation8 + $0x2a4] ss:$12 sps:$4 sm:$0xff]   ;;  %v1709_v59 = vld [vmem:[#allocation8 + $0x10c] ss:$12 sps:$4 sm:$0xff]  }
  0x54   :  { %921 = vmatprep.subr.bf16.mxu0 %v1655_v23  ;;  %962 = vmatprep.subr.bf16.mxu1 %v1658_v24  ;;  %v1712_v60 = vld [vmem:[#allocation8 + $0x28c] ss:$12 sps:$4 sm:$0xff]   ;;  %v1707_v61 = vld [vmem:[#allocation8 + $0x108] ss:$12 sps:$4 sm:$0xff]   ;;  %v1713_v1 = vld [vmem:[#allocation8 + $0xf0] ss:$12 sps:$4 sm:$0xff]  }
  0x55   :  { %v1710_v62 = vld [vmem:[#allocation8 + $0x288] ss:$12 sps:$4 sm:$0xff]   ;;  %v1716_v2 = vld [vmem:[#allocation8 + $0x270] ss:$12 sps:$4 sm:$0xff]   ;;  %v1719_v5 = vld [vmem:[#allocation8 + $0xd8] ss:$12 sps:$4 sm:$0xff]  }
  0x56   :  { %v1715_v63 = vld [vmem:[#allocation8 + $0xf4] ss:$12 sps:$4 sm:$0xff]   ;;  %v1721_v3 = vld [vmem:[#allocation8 + $0xdc] ss:$12 sps:$4 sm:$0xff]   ;;  %v1722_v6 = vld [vmem:[#allocation8 + $0x258] ss:$12 sps:$4 sm:$0xff]  }
  0x57   :  { %922 = vmatpush1.bf16.msra.mxu0 %v1653_v25  ;;  %963 = vmatpush1.bf16.msra.mxu1 %v1656_v26  ;;  %v1718_v0 = vld [vmem:[#allocation8 + $0x274] ss:$12 sps:$4 sm:$0xff]   ;;  %v1724_v4 = vld [vmem:[#allocation8 + $0x25c] ss:$12 sps:$4 sm:$0xff]   ;;  %v1727_v7 = vld [vmem:[#allocation8 + $0xc4] ss:$12 sps:$4 sm:$0xff]  }
  0x58   :  { %923 = vmatprep.subr.bf16.mxu0 %v1661_v27  ;;  %964 = vmatprep.subr.bf16.mxu1 %v1664_v28  ;;  %v1730_v8 = vld [vmem:[#allocation8 + $0x244] ss:$12 sps:$4 sm:$0xff]   ;;  %v1725_v9 = vld [vmem:[#allocation8 + $0xc0] ss:$12 sps:$4 sm:$0xff]   ;;  %v1987_v14 = vshrl.u32 %v104_v13, 7  ;;  %s1931_s30 = smov [#allocation11]  }
  0x59   :  { %v1728_v10 = vld [vmem:[#allocation8 + $0x240] ss:$12 sps:$4 sm:$0xff]   ;;  %v1731_v11 = vld [vmem:[#allocation8 + $0x170] ss:$12 sps:$4 sm:$0xff]   ;;  %s1371_s8 = sshll.u32 %s1931_s30, 4  ;;  %s1372_s8 = int_to_ptr.vmem [resolvable:$true] %s1371_s8 }
  0x5a   :  { %v1732_v12 = vld [vmem:[#allocation8 + $0x2f0] ss:$12 sps:$4 sm:$0xff]   ;;  %v106_v15 = vsub.s32 0, %v1987_v14  ;;  %v114_v16 = vsub.s32 2, %v1987_v14  ;;  %v110_v18 = vsub.s32 1, %v1987_v14  ;;  %v118_v19 = vsub.s32 3, %v1987_v14  ;;  %p1894_p12 = scmp.lt.s32.totalorder %s1372_s8, %s1372_s8 }
  0x5b   :  { %924 = vmatpush1.bf16.msra.mxu0 %v1659_v29  ;;  %965 = vmatpush1.bf16.msra.mxu1 %v1662_v30  ;;  %v102_v17 = vld [vmem:[#allocation7] sm:$0xf]  ;;  %v1766_v13 = vld [vmem:[#allocation10 + $0x30] sm:$0xff]   ;;  %s1889_s9 = scalar_lea.vmem %s1372_s8, 128 }
  0x5c   :  { %925 = vmatprep.subr.bf16.mxu0 %v1667_v31  ;;  %966 = vmatprep.subr.bf16.mxu1 %v1670_v32  ;;  %v107_v20 = vrot.slane %v102_v17, %v106_v15  ;;  %v115_v21 = vrot.slane %v102_v17, %v114_v16  ;;  %v111_v22 = vrot.slane %v102_v17, %v110_v18  ;;  %v1488_v14 = vld [vmem:[%s2028_s6] ss:$0 sm:$0xff]  ;;  %p1890_p11 = scmp.ne.s32.totalorder %s1372_s8, %s1889_s9  ;;  %p1895_p13 = scmp.lt.s32.totalorder %s1889_s9, %s1889_s9 }
  0x5d   :  { %v119_v23 = vrot.slane %v102_v17, %v118_v19  ;;  %v1767_v17 = vld [vmem:[#allocation10 + $0x68] sm:$0xff]  }
  0x5e   :  { %v1768_v19 = vld [vmem:[#allocation10 + $0x28] sm:$0xff]   ;;  %p1896_p0 = por %p1895_p13, %p1894_p12 }
  0x5f   :  { %926 = vmatpush1.bf16.msra.mxu0 %v1665_v33  ;;  %967 = vmatpush1.bf16.msra.mxu1 %v1668_v34 }
  0x60   :  { %927 = vmatprep.subr.bf16.mxu0 %v1673_v35  ;;  %968 = vmatprep.subr.bf16.mxu1 %v1676_v36  ;;  %p1897_p1 = pnand %p1896_p0, %p1890_p11 }
  0x63   :  { %928 = vmatpush1.bf16.msra.mxu0 %v1671_v37  ;;  %969 = vmatpush1.bf16.msra.mxu1 %v1674_v38 }
  0x64   :  { %929 = vmatprep.subr.bf16.mxu0 %v1679_v39  ;;  %970 = vmatprep.subr.bf16.mxu1 %v1682_v40 }
  0x67   :  { %930 = vmatpush1.bf16.msra.mxu0 %v1677_v41  ;;  %971 = vmatpush1.bf16.msra.mxu1 %v1680_v42 }
  0x68   :  { %931 = vmatprep.subr.bf16.mxu0 %v1685_v43  ;;  %972 = vmatprep.subr.bf16.mxu1 %v1688_v44  ;;  %v1733_v43 = vld [vmem:[#allocation8 + $0xb0] ss:$12 sps:$4 sm:$0xff]  }
  0x69   :  { %v1734_v44 = vld [vmem:[#allocation8 + $0x230] ss:$12 sps:$4 sm:$0xff]  }
  0x6b   :  { %932 = vmatpush2.bf16.msra.mxu0 %v1683_v45  ;;  %973 = vmatpush2.bf16.msra.mxu1 %v1686_v46  ;;  %v1735_v46 = vld [vmem:[#allocation8 + $0x158] ss:$12 sps:$4 sm:$0xff]  }
  0x6c   :  { %933 = vmatprep.subr.bf16.mxu0 %v1691_v47  ;;  %974 = vmatprep.subr.bf16.mxu1 %v1694_v48  ;;  %v1736_v47 = vld [vmem:[#allocation8 + $0x2d8] ss:$12 sps:$4 sm:$0xff]  }
  0x6d   :  { %v1737_v48 = vld [vmem:[#allocation8 + $0x98] ss:$12 sps:$4 sm:$0xff]  }
  0x6f   :  { %934 = vmatpush2.bf16.msra.mxu0 %v1689_v49  ;;  %975 = vmatpush2.bf16.msra.mxu1 %v1692_v50  ;;  %v1738_v49 = vld [vmem:[#allocation8 + $0x218] ss:$12 sps:$4 sm:$0xff]   ;;  %v1739_v50 = vld [vmem:[#allocation8 + $0x140] ss:$12 sps:$4 sm:$0xff]  }
  0x70   :  { %935 = vmatprep.subr.bf16.mxu0 %v1697_v51  ;;  %976 = vmatprep.subr.bf16.mxu1 %v1700_v52  ;;  %v1740_v51 = vld [vmem:[#allocation8 + $0x2c0] ss:$12 sps:$4 sm:$0xff]  }
  0x71   :  { %v1741_v52 = vld [vmem:[#allocation8 + $0x80] ss:$12 sps:$4 sm:$0xff]  }
  0x73   :  { %936 = vmatpush2.bf16.msra.mxu0 %v1695_v53  ;;  %977 = vmatpush2.bf16.msra.mxu1 %v1698_v54  ;;  %v1742_v53 = vld [vmem:[#allocation8 + $0x200] ss:$12 sps:$4 sm:$0xff]   ;;  %v1743_v54 = vld [vmem:[#allocation8 + $0x128] ss:$12 sps:$4 sm:$0xff]  }
  0x74   :  { %937 = vmatprep.subr.bf16.mxu0 %v1703_v55  ;;  %978 = vmatprep.subr.bf16.mxu1 %v1706_v56  ;;  %v1744_v55 = vld [vmem:[#allocation8 + $0x2a8] ss:$12 sps:$4 sm:$0xff]  }
  0x75   :  { %v1745_v56 = vld [vmem:[#allocation8 + $0x68] ss:$12 sps:$4 sm:$0xff]  }
  0x77   :  { %938 = vmatpush2.bf16.msra.mxu0 %v1701_v57  ;;  %979 = vmatpush2.bf16.msra.mxu1 %v1704_v58  ;;  %v1746_v57 = vld [vmem:[#allocation8 + $0x1e8] ss:$12 sps:$4 sm:$0xff]   ;;  %v1747_v58 = vld [vmem:[#allocation8 + $0x110] ss:$12 sps:$4 sm:$0xff]  }
  0x78   :  { %939 = vmatprep.subr.bf16.mxu0 %v1709_v59  ;;  %980 = vmatprep.subr.bf16.mxu1 %v1712_v60  ;;  %v1748_v59 = vld [vmem:[#allocation8 + $0x290] ss:$12 sps:$4 sm:$0xff]  }
  0x79   :  { %v1749_v60 = vld [vmem:[#allocation8 + $0x50] ss:$12 sps:$4 sm:$0xff]  }
  0x7b   :  { %940 = vmatpush2.bf16.msra.mxu0 %v1707_v61  ;;  %981 = vmatpush2.bf16.msra.mxu1 %v1710_v62  ;;  %v1750_v61 = vld [vmem:[#allocation8 + $0x1d0] ss:$12 sps:$4 sm:$0xff]   ;;  %v1751_v62 = vld [vmem:[#allocation8 + $0xf8] ss:$12 sps:$4 sm:$0xff]  }
  0x7c   :  { %941 = vmatprep.subr.bf16.mxu0 %v1715_v63  ;;  %982 = vmatprep.subr.bf16.mxu1 %v1718_v0  ;;  %v1752_v63 = vld [vmem:[#allocation8 + $0x278] ss:$12 sps:$4 sm:$0xff]  }
  0x7d   :  { %v1753_v0 = vld [vmem:[#allocation8 + $0x38] ss:$12 sps:$4 sm:$0xff]  }
  0x7f   :  { %942 = vmatpush2.bf16.msra.mxu0 %v1713_v1  ;;  %983 = vmatpush2.bf16.msra.mxu1 %v1716_v2  ;;  %v1754_v1 = vld [vmem:[#allocation8 + $0x1b8] ss:$12 sps:$4 sm:$0xff]   ;;  %v1755_v2 = vld [vmem:[#allocation8 + $0xe0] ss:$12 sps:$4 sm:$0xff]  }
  0x80   :  { %943 = vmatprep.subr.bf16.mxu0 %v1721_v3  ;;  %984 = vmatprep.subr.bf16.mxu1 %v1724_v4  ;;  %v1756_v3 = vld [vmem:[#allocation8 + $0x260] ss:$12 sps:$4 sm:$0xff]  }
  0x81   :  { %v1757_v4 = vld [vmem:[#allocation8 + $0x20] ss:$12 sps:$4 sm:$0xff]  }
  0x83   :  { %944 = vmatpush2.bf16.msra.mxu0 %v1719_v5  ;;  %985 = vmatpush2.bf16.msra.mxu1 %v1722_v6  ;;  %v1758_v5 = vld [vmem:[#allocation8 + $0x1a0] ss:$12 sps:$4 sm:$0xff]   ;;  %v1759_v6 = vld [vmem:[#allocation8 + $0xc8] ss:$12 sps:$4 sm:$0xff]  }
  0x84   :  { %945 = vmatprep.subr.bf16.mxu0 %v1727_v7  ;;  %986 = vmatprep.subr.bf16.mxu1 %v1730_v8  ;;  %v1760_v7 = vld [vmem:[#allocation8 + $0x248] ss:$12 sps:$4 sm:$0xff]  }
  0x85   :  { %v1761_v8 = vld [vmem:[#allocation8 + $0x8] ss:$12 sps:$4 sm:$0xff]  }
  0x87   :  { %946 = vmatpush2.bf16.msra.mxu0 %v1725_v9  ;;  %987 = vmatpush2.bf16.msra.mxu1 %v1728_v10  ;;  %v1762_v9 = vld [vmem:[#allocation8 + $0x188] ss:$12 sps:$4 sm:$0xff]   ;;  %v1763_v10 = vld [vmem:[#allocation10 + $0x78] sm:$0xff]  }
  0x88   :  { %1513 = vmatprep.subr.bf16.mxu0 %v1731_v11  ;;  %1535 = vmatprep.subr.bf16.mxu1 %v1732_v12  ;;  %v1764_v11 = vld [vmem:[#allocation10 + $0x38] sm:$0xff]   ;;  %v1765_v12 = vld [vmem:[#allocation10 + $0x70] sm:$0xff]  }
 0x10a   :  { %v202_v24 = vpop.f32.mrf.mxu0  ;;  %v243_v25 = vpop.f32.mrf.mxu1 }
 0x10b   :  { %v203_v26 = vadd.f32 %v202_v24, %v107_v20  ;;  %v244_v27 = vadd.f32 %v243_v25, %v115_v21  ;;  %v1769_v20 = vld [vmem:[#allocation10 + $0x60] sm:$0xff]   ;;  %v1773_v24 = vld [vmem:[#allocation10 + $0x50] sm:$0xff]  }
 0x10c   :  { %v204_v28 = vpop.f32.mrf.mxu0  ;;  %v245_v29 = vpop.f32.mrf.mxu1  ;;  %v1770_v21 = vld [vmem:[#allocation10 + $0x20] sm:$0xff]   ;;  %v1774_v25 = vld [vmem:[#allocation10 + $0x10] sm:$0xff]  }
 0x10d   :  { %v252_v30 = vmax.f32 %v244_v27, 0.0  ;;  %v205_v31 = vadd.f32 %v204_v28, %v111_v22  ;;  %v246_v32 = vadd.f32 %v245_v29, %v119_v23  ;;  %v250_v33 = vmax.f32 %v203_v26, 0.0  ;;  %v1771_v22 = vld [vmem:[#allocation10 + $0x58] sm:$0xff]   ;;  %v1775_v26 = vld [vmem:[#allocation10 + $0x48] sm:$0xff]   ;;  %v1777_v28 = vld [vmem:[#allocation10 + $0x40] sm:$0xff]  }
 0x10e   :  { %v206_v34 = vpop.f32.mrf.mxu0  ;;  %v247_v35 = vpop.f32.mrf.mxu1  ;;  %v1772_v23 = vld [vmem:[#allocation10 + $0x18] sm:$0xff]   ;;  %v1776_v27 = vld [vmem:[#allocation10 + $0x8] sm:$0xff]   ;;  %v1778_v29 = vld [vmem:[#allocation10] sm:$0xff]  }
 0x10f   :  { %v251_v36 = vmax.f32 %v205_v31, 0.0  ;;  %v253_v37 = vmax.f32 %v246_v32, 0.0  ;;  %v1999_v38 = vpack.c.bf16 %v252_v30, %v252_v30  ;;  %v2001_v45 = vpack.c.bf16 %v250_v33, %v250_v33  ;;  %v1779_v30 = vld [vmem:[#allocation10 + $0xb8] sm:$0xff]   ;;  %v1780_v32 = vld [vmem:[#allocation10 + $0xb0] sm:$0xff]   ;;  %v1781_v33 = vld [vmem:[#allocation10 + $0xa8] sm:$0xff]  }
 0x110   :  { %v207_v39 = vpop.f32.mrf.mxu0  ;;  %v248_v40 = vpop.f32.mrf.mxu1  ;;  %v1929_v31 = vmov 0.0   ;;  %v1782_v34 = vld [vmem:[#allocation10 + $0xa0] sm:$0xff]   ;;  %v1783_v35 = vld [vmem:[#allocation10 + $0x98] sm:$0xff]  }
 0x111   :  { %v255_v41 = vpack.c.bf16 %v251_v36, %v251_v36  ;;  %v257_v42 = vpack.c.bf16 %v253_v37, %v253_v37  ;;  %v1784_v36 = vld [vmem:[#allocation10 + $0x90] sm:$0xff]   ;;  %v1785_v37 = vld [vmem:[#allocation10 + $0x88] sm:$0xff]  }
 0x112   :  { %v386_v39 = vld [vmem:[%s2026_s4] sm:$0x7] }
 0x113   :  { %947 = vmatprep.mubr.bf16.mxu0 %v255_v41  ;;  %988 = vmatprep.mubr.bf16.mxu1 %v257_v42  ;;  %v391_v40 = vrot.slane %v386_v39, %v106_v15 }
 0x114   :  { %948 = vmatmul.mubr.bf16.vlgmr.msra.gmra.mxu0 %v2001_v45  ;;  %989 = vmatmul.mubr.bf16.vlgmr.msra.gmra.mxu1 %v1999_v38 }
 0x115   :  { %1514 = vmatpush3.bf16.msra.mxu0 %v1733_v43  ;;  %1536 = vmatpush3.bf16.msra.mxu1 %v1734_v44 }
 0x116   :  { %1029 = vmatprep.mubr.bf16.mxu0 %v255_v41  ;;  %1069 = vmatprep.mubr.bf16.mxu1 %v257_v42  ;;  %v395_v41 = vrot.slane %v386_v39, %v110_v18 }
 0x117   :  { %1515 = vmatprep.subr.bf16.mxu0 %v1735_v46  ;;  %1537 = vmatprep.subr.bf16.mxu1 %v1736_v47 }
 0x119   :  { %1516 = vmatpush3.bf16.msra.mxu0 %v1737_v48  ;;  %1538 = vmatpush3.bf16.msra.mxu1 %v1738_v49 }
 0x11a   :  { %1517 = vmatprep.subr.bf16.mxu0 %v1739_v50  ;;  %1539 = vmatprep.subr.bf16.mxu1 %v1740_v51 }
 0x11d   :  { %1518 = vmatpush3.bf16.msra.mxu0 %v1741_v52  ;;  %1540 = vmatpush3.bf16.msra.mxu1 %v1742_v53 }
 0x11e   :  { %1519 = vmatprep.subr.bf16.mxu0 %v1743_v54  ;;  %1541 = vmatprep.subr.bf16.mxu1 %v1744_v55 }
 0x121   :  { %1520 = vmatpush3.bf16.msra.mxu0 %v1745_v56  ;;  %1542 = vmatpush3.bf16.msra.mxu1 %v1746_v57 }
 0x122   :  { %1521 = vmatprep.subr.bf16.mxu0 %v1747_v58  ;;  %1543 = vmatprep.subr.bf16.mxu1 %v1748_v59  ;;  %v399_v58 = vrot.slane %v386_v39, %v114_v16 }
 0x125   :  { %1522 = vmatpush3.bf16.msra.mxu0 %v1749_v60  ;;  %1544 = vmatpush3.bf16.msra.mxu1 %v1750_v61 }
 0x126   :  { %1523 = vmatprep.subr.bf16.mxu0 %v1751_v62  ;;  %1545 = vmatprep.subr.bf16.mxu1 %v1752_v63 }
 0x129   :  { %1524 = vmatpush3.bf16.msra.mxu0 %v1753_v0  ;;  %1546 = vmatpush3.bf16.msra.mxu1 %v1754_v1 }
 0x12a   :  { %1525 = vmatprep.subr.bf16.mxu0 %v1755_v2  ;;  %1547 = vmatprep.subr.bf16.mxu1 %v1756_v3 }
 0x12d   :  { %1526 = vmatpush3.bf16.msra.mxu0 %v1757_v4  ;;  %1548 = vmatpush3.bf16.msra.mxu1 %v1758_v5 }
 0x12e   :  { %1527 = vmatprep.subr.bf16.mxu0 %v1759_v6  ;;  %1549 = vmatprep.subr.bf16.mxu1 %v1760_v7 }
 0x131   :  { %1528 = vmatpush3.bf16.msra.mxu0 %v1761_v8  ;;  %1550 = vmatpush3.bf16.msra.mxu1 %v1762_v9 }
 0x132   :  { %1557 = vmatprep.subr.bf16.mxu0 %v1763_v10  ;;  %1588 = vmatprep.subr.bf16.mxu1 %v1929_v31 }
 0x134   :  { %1030 = vmatmul.mubr.bf16.vlgmr.msra.gmra.mxu0 %v2001_v45  ;;  %1070 = vmatmul.mubr.bf16.vlgmr.msra.gmra.mxu1 %v1999_v38  ;;  %v1786_v38 = vld [vmem:[#allocation10 + $0x80] sm:$0xff]  }
 0x135   :  { %1558 = vmatpush3.bf16.msra.mxu0 %v1764_v11  ;;  %1589 = vmatpush3.bf16.msra.mxu1 %v1779_v30 }
 0x136   :  { %1559 = vmatprep.subr.bf16.mxu0 %v1765_v12  ;;  %1590 = vmatprep.subr.bf16.mxu1 %v1929_v31 }
 0x137   :  { %1604 = vmatprep.mubr.msk.bf16.mxu1 %vm1930_vm1, %v1929_v31 }
 0x139   :  { %1560 = vmatpush3.bf16.msra.mxu0 %v1766_v13  ;;  %1591 = vmatpush3.bf16.msra.mxu1 %v1780_v32 }
 0x13a   :  { %1561 = vmatprep.subr.bf16.mxu0 %v1767_v17  ;;  %1592 = vmatprep.subr.bf16.mxu1 %v1929_v31 }
 0x13d   :  { %1562 = vmatpush3.bf16.msra.mxu0 %v1768_v19  ;;  %1593 = vmatpush3.bf16.msra.mxu1 %v1781_v33 }
 0x13e   :  { %1563 = vmatprep.subr.bf16.mxu0 %v1769_v20  ;;  %1594 = vmatprep.subr.bf16.mxu1 %v1929_v31 }
 0x141   :  { %1564 = vmatpush3.bf16.msra.mxu0 %v1770_v21  ;;  %1595 = vmatpush3.bf16.msra.mxu1 %v1782_v34 }
 0x142   :  { %1565 = vmatprep.subr.bf16.mxu0 %v1771_v22  ;;  %1596 = vmatprep.subr.bf16.mxu1 %v1929_v31 }
 0x145   :  { %1566 = vmatpush3.bf16.msra.mxu0 %v1772_v23  ;;  %1597 = vmatpush3.bf16.msra.mxu1 %v1783_v35 }
 0x146   :  { %1567 = vmatprep.subr.bf16.mxu0 %v1773_v24  ;;  %1598 = vmatprep.subr.bf16.mxu1 %v1929_v31 }
 0x149   :  { %1568 = vmatpush3.bf16.msra.mxu0 %v1774_v25  ;;  %1599 = vmatpush3.bf16.msra.mxu1 %v1784_v36 }
 0x14a   :  { %1569 = vmatprep.subr.bf16.mxu0 %v1775_v26  ;;  %1600 = vmatprep.subr.bf16.mxu1 %v1929_v31 }
 0x14d   :  { %1570 = vmatpush3.bf16.msra.mxu0 %v1776_v27  ;;  %1601 = vmatpush3.bf16.msra.mxu1 %v1785_v37 }
 0x14e   :  { %1571 = vmatprep.subr.bf16.mxu0 %v1777_v28  ;;  %1602 = vmatprep.subr.bf16.mxu1 %v1929_v31 }
 0x151   :  { %1572 = vmatpush3.bf16.msra.mxu0 %v1778_v29  ;;  %1603 = vmatpush3.bf16.msra.mxu1 %v1786_v38 }
 0x1d4   :  { %v949_v42 = vpop.f32.mrf.mxu0  ;;  %v990_v43 = vpop.f32.mrf.mxu1 }
 0x1d5   :  { %v950_v44 = vadd.f32 %v949_v42, %v391_v40 }
 0x1d6   :  { %v951_v45 = vpop.f32.mrf.mxu0  ;;  %v992_v46 = vpop.f32.mrf.mxu1 }
 0x1d7   :  { %v991_v47 = vadd.f32 %v990_v43, %v950_v44  ;;  %v952_v48 = vadd.f32 %v951_v45, %v395_v41 }
 0x1d8   :  { %v953_v49 = vpop.f32.mrf.mxu0  ;;  %v994_v50 = vpop.f32.mrf.mxu1 }
 0x1d9   :  { %v993_v51 = vadd.f32 %v992_v46, %v952_v48  ;;  %v1077_v52 = vmax.f32 %v991_v47, 0.0 }
 0x1da   :  { %v954_v53 = vpop.f32.mrf.mxu0  ;;  %v995_v54 = vpop.f32.mrf.mxu1 }
 0x1db   :  { %v1078_v55 = vmax.f32 %v993_v51, 0.0  ;;  %v1080_v57 = vpack.c.bf16 %v1077_v52, %v1077_v52 }
 0x1dd   :  { %v1081_v56 = vpack.c.bf16 %v1078_v55, %v1078_v55 }
 0x1df   :  { %1314 = vmatprep.mubr.bf16.mxu0 %v1081_v56 }
 0x1e0   :  { %1315 = vmatmul.mubr.bf16.vlgmr.msra.gmra.mxu0 %v1080_v57 }
 0x1f4   :  { %v1529_v15 = vpop.f32.mrf.mxu0  ;;  %v1551_v18 = vpop.f32.mrf.mxu1 }
 0x1f6   :  { %v1530_v59 = vpop.f32.mrf.mxu0  ;;  %v1552_v60 = vpop.f32.mrf.mxu1 }
 0x1f7   :  { %v1531_v61 = vadd.f32 %v1530_v59, %v1529_v15  ;;  %v1553_v1 = vadd.f32 %v1552_v60, %v1551_v18 }
 0x1f8   :  { %v1532_v62 = vpop.f32.mrf.mxu0  ;;  %v1554_v63 = vpop.f32.mrf.mxu1 }
 0x1f9   :  { %v1032_v0 = vadd.f32 %v1531_v61, %v399_v58 }
 0x1fa   :  { %v1533_v2 = vpop.f32.mrf.mxu0  ;;  %v1555_v3 = vpop.f32.mrf.mxu1 }
 0x1fb   :  { %v1072_v4 = vadd.f32 %v1553_v1, %v1032_v0 }
 0x1fd   :  { %v1079_v5 = vmax.f32 %v1072_v4, 0.0 }
 0x1ff   :  { %v1082_v6 = vpack.c.bf16 %v1079_v5, %v1079_v5 }
 0x201   :  { %1605 = vmatmul.mubr.bf16.vlgmr.msra.gmra.mxu1 %v1082_v6 }
 0x2a0   :  { %v1573_v7 = vpop.f32.mrf.mxu0 }
 0x2a2   :  { %v1574_v8 = vpop.f32.mrf.mxu0 }
 0x2a3   :  { %v1575_v11 = vadd.f32 %v1574_v8, %v1573_v7 }
 0x2a4   :  { %v1576_v9 = vpop.f32.mrf.mxu0 }
 0x2a5   :  { %v1317_v16 = vadd.f32 %v1575_v11, %v1488_v14 }
 0x2a6   :  { %v1577_v10 = vpop.f32.mrf.mxu0 }
 0x2c1   :  { %v1356_v12 = vpop.f32.mrf.mxu1 }
 0x2c2   :  { %v1357_v13 = vadd.f32 %v1356_v12, %v1317_v16 }
 0x2c3   :  { %v1606_v17 = vpop.f32.mrf.mxu1 }
 0x2c4   :  { %1787 = vtanh.f32 %v1357_v13 }
 0x2c5   :  { %v1359_v19 = vpop.f32.mrf.mxu1 }
 0x2c7   :  { %v1607_v20 = vpop.f32.mrf.mxu1 }
 0x2d1   :  { %v1788_v21 = vpop.eup %1787 }
 0x2d2   :  { %v1363_v22 = vmul.f32 2.0, %v1788_v21 }
 0x2d4   :  { %1364 = vst [vmem:[#allocation11] sm:$0xff] %v1363_v22 }
 0x2d5   :  { %1900 = shalt.err (!%p1897_p1)
}
 0x2d6   :  { %1374 = dma.vmem_to_hbm [thread:$0]  %s1372_s8, 128, %s2029_s7, [#allocation4]  }
 0x2d7   :  { %1915 = dma.done.wait [#allocation4], 128  }
 0x2d8   :  { %1916 = vsyncadd [#allocation4], 4294967168 }
 0x2d9   :  { %1378 = vsyncpa [#allocation3], 1 }
 0x2da   :  { %1379 = vsyncpa [#allocation6], 1 }
 0x2db   :  { %1380 = vsyncpa [#allocation9], 1 }
 0x2dc   :  { %1381 = vsyncpa [#allocation4], 1 }

</bundles_post_ra>
